<compile_context>
chip_gen: v7x
topology: tpu7x:2x2x1
jax: 0.10.0
libtpu: 0.0.40
codegen_flags: <defaults>
</compile_context>

<pallas_src>
import math

import numpy as np
import jax
import jax.numpy as jnp
from jax.scipy.special import logsumexp
from jax.experimental import pallas as pl
from jax.experimental.pallas import tpu as pltpu

# ----------------------------- configuration -------------------------------
HIDDEN = 32        # config.hidden_size
NUM_LABELS = 32    # config.num_labels
EMB_SIZE = 64      # emb_size
BLOCK_SIZE = 16    # block_size
NUM_HEADS = 4      # encoder attention heads (stub)
GAT_HEADS = 8
SEQ_LEN = 64
BATCH = 2
VOCAB = 100

PAIR_TILE = 512    # max pair tile (M dim of every MXU matmul)
FEAT_LANES = 128   # lane-dense packed per-pair feature row [rs|hs|ts|1|pad]
OUT_LANES = 128    # lane-dense packed output row [logits|pad]

# The reference's `bilinear = Linear(3*num_labels, num_labels)` consumes
# cat([bl(hidden), gri(NL), lwl(NL)]) and therefore implicitly requires
# hidden_size == num_labels; we keep that invariant explicit.
assert HIDDEN == NUM_LABELS
assert EMB_SIZE % BLOCK_SIZE == 0
assert 3 * HIDDEN + 1 <= FEAT_LANES and NUM_LABELS <= OUT_LANES


def _round_up(x, m):
    return ((x + m - 1) // m) * m


def _choose_tp(num_pairs):
    """Pair-tile size: big for MXU amortization, >=2 grid steps on large inputs
    (so both v7x TensorCores get work), multiple of 16 (bf16 sublane tile)."""
    p16 = _round_up(max(num_pairs, 1), 16)
    if p16 <= 256:
        return p16                       # tiny input: one small tile
    half = _round_up((p16 + 1) // 2, 16)
    return min(PAIR_TILE, half)


# ----------------------------- Pallas kernel --------------------------------
def _docre_head_kernel(feat_ref, htm_ref, wf_ref, wht_ref, rt_ref, wbl_ref,
                       out_ref):
    f32 = jnp.float32
    bf16 = jnp.bfloat16
    H, E, NL = HIDDEN, EMB_SIZE, NUM_LABELS

    feat = feat_ref[...]                          # (tp, 128) bf16 = [rs|hs|ts|1|0]
    htm = htm_ref[...].astype(f32)                # (tp, 2M, H) f32 for VPU math
    tp, two_m, _ = htm.shape
    m = two_m // 2

    # ---- one fused matmul over [rs | hs | ts | 1] ---------------------------
    #   cols 0:H      -> qk     = rs @ (Wq^T Wk) / sqrt(H)   (mention-score query)
    #   cols H:H+E    -> rs @ HEb + head_extractor bias
    #   cols ..:H+2E  -> rs @ TEb + tail_extractor bias
    #   cols ..:+NL   -> hs @ (L^T W2a BWc) + ts @ (L^T W2b BWc) + folded bias
    wide = jnp.dot(feat, wf_ref[...], preferred_element_type=f32)    # (tp, 192)
    qk = wide[:, :H]
    he_lin = wide[:, H:H + E]
    te_lin = wide[:, H + E:H + 2 * E]
    logits = wide[:, H + 2 * E:H + 2 * E + NL]

    # ---- get_entity_representation: mention attention pooling --------------
    # W_k folded into qk host-side ((W_k m).(W_q c) == m.(c @ Wq^T Wk)).
    # NOTE: zero-padded mentions are NOT masked, matching the PyTorch reference.
    scores = jnp.sum(htm * qk[:, None, :], axis=-1)                  # (tp, 2M)
    h_attn = jax.nn.softmax(scores[:, :m], axis=-1)
    t_attn = jax.nn.softmax(scores[:, m:], axis=-1)
    h_ent = jnp.sum(h_attn[:, :, None] * htm[:, :m, :], axis=1)      # (tp, H)
    t_ent = jnp.sum(t_attn[:, :, None] * htm[:, m:, :], axis=1)

    # ---- shared-LHS fused matmuls: extractor + folded-linear1 logits -------
    wht = wht_ref[...]                                               # (2H, E+NL)
    wide_h = jnp.dot(h_ent.astype(bf16), wht[:H], preferred_element_type=f32)
    wide_t = jnp.dot(t_ent.astype(bf16), wht[H:], preferred_element_type=f32)
    hz = jnp.tanh(wide_h[:, :E] + he_lin)                            # (tp, E)
    tz = jnp.tanh(wide_t[:, :E] + te_lin)
    logits = logits + wide_h[:, E:] + wide_t[:, E:]

    # ---- grouped (block) bilinear slab via constant 0/1 expansion matmuls --
    # (replaces broadcast_to + cross-tile reshape; slab is built on the MXU)
    rt = rt_ref[...]                                                 # (2E, E*BS)
    hz_rep = jnp.dot(hz.astype(bf16), rt[:E], preferred_element_type=f32)
    tz_til = jnp.dot(tz.astype(bf16), rt[E:], preferred_element_type=f32)
    bb = (hz_rep * tz_til).astype(bf16)                              # (tp, E*BS)
    logits = logits + jnp.dot(bb, wbl_ref[...], preferred_element_type=f32)

    # ---- single lane-dense 128-wide store: [logits | zero pad] -------------
    out_ref[...] = jnp.concatenate(
        [logits, jnp.zeros((tp, OUT_LANES - NL), f32)], axis=1)


# ----------------------------- host-side weight folding ---------------------
def _prepare_weights(params):
    """Fold every linear chain in f32 on the host and pack into 4 bf16 slabs."""
    f32 = jnp.float32
    bf16 = jnp.bfloat16
    H, NL, E, BS = HIDDEN, NUM_LABELS, EMB_SIZE, BLOCK_SIZE

    Wq = jnp.asarray(params['W_q'], f32)                 # (H, H) torch (out,in)
    Wk = jnp.asarray(params['W_k'], f32)
    L = jnp.asarray(params['label_embedding'], f32)      # (NL, H)

    W1t = jnp.asarray(params['linear1_w'], f32).T        # (2H, NL)
    W2t = jnp.asarray(params['linear2_w'], f32).T        # (2NL, NL)
    HEt = jnp.asarray(params['head_extractor_w'], f32).T  # (2H, E)
    TEt = jnp.asarray(params['tail_extractor_w'], f32).T  # (2H, E)
    B1t = jnp.asarray(params['bilinear1_w'], f32).T       # (E*BS, H)
    BWt = jnp.asarray(params['bilinear_w'], f32).T        # (3NL, NL)

    b1_lin = jnp.asarray(params['linear1_b'], f32)
    b2_lin = jnp.asarray(params['linear2_b'], f32)
    he_b = jnp.asarray(params['head_extractor_b'], f32)
    te_b = jnp.asarray(params['tail_extractor_b'], f32)
    b1b = jnp.asarray(params['bilinear1_b'], f32)
    bw_b = jnp.asarray(params['bilinear_b'], f32)

    BWa, BWb, BWc = BWt[:NL], BWt[NL:2 * NL], BWt[2 * NL:]

    # Folded chains (exact in exact arithmetic: all intermediates are linear).
    wqk = (Wq.T @ Wk) / math.sqrt(H)      # rs -> mention-score query
    WH1 = W1t[:H] @ BWb                   # h_ent -> logits (linear1 ∘ bilinear)
    WT1 = W1t[H:] @ BWb                   # t_ent -> logits
    WHS = L.T @ W2t[:NL] @ BWc            # hs -> logits (label-info path)
    WTS = L.T @ W2t[NL:] @ BWc            # ts -> logits
    WBL = B1t @ BWa                       # block-bilinear slab -> logits
    bias_fold = bw_b + b1b @ BWa + b1_lin @ BWb + b2_lin @ BWc

    HEa, HEb = HEt[:H], HEt[H:]
    TEa, TEb = TEt[:H], TEt[H:]

    # Fused projection of feat = [rs | hs | ts | 1 | 0pad]  ->  (128, 192).
    # Row 3H is the constant-1 lane, i.e. all biases live here.
    wf = jnp.zeros((FEAT_LANES, H + 2 * E + NL), f32)
    wf = wf.at[0:H, 0:H].set(wqk)
    wf = wf.at[0:H, H:H + E].set(HEb)
    wf = wf.at[0:H, H + E:H + 2 * E].set(TEb)
    wf = wf.at[H:2 * H, H + 2 * E:].set(WHS)
    wf = wf.at[2 * H:3 * H, H + 2 * E:].set(WTS)
    wf = wf.at[3 * H, H:H + E].set(he_b)
    wf = wf.at[3 * H, H + E:H + 2 * E].set(te_b)
    wf = wf.at[3 * H, H + 2 * E:].set(bias_fold)

    # Shared-LHS fusion: [head_extractor_A | linear1_h@BWb] stacked over
    # [tail_extractor_A | linear1_t@BWb]  ->  (2H, E+NL).
    wht = jnp.zeros((2 * H, E + NL), f32)
    wht = wht.at[:H, :E].set(HEa)
    wht = wht.at[:H, E:].set(WH1)
    wht = wht.at[H:, :E].set(TEa)
    wht = wht.at[H:, E:].set(WT1)

    # Constant 0/1 expansion matrices for the grouped bilinear slab:
    #   hz_rep[p, c] = hz[p, c // BS]
    #   tz_til[p, c] = tz[p, (c // BS^2) * BS + (c % BS)]
    rep = np.zeros((E, E * BS), np.float32)
    til = np.zeros((E, E * BS), np.float32)
    for c in range(E * BS):
        rep[c // BS, c] = 1.0
        til[(c // (BS * BS)) * BS + (c % BS), c] = 1.0
    rt = jnp.concatenate([jnp.asarray(rep), jnp.asarray(til)], axis=0)  # (2E, E*BS)

    return wf.astype(bf16), wht.astype(bf16), rt.astype(bf16), WBL.astype(bf16)


# ----------------------------- wrapper ---------------------------------------
def docre_relation_head(hs, ts, rs, hm, tm, params):
    """Packs per-pair features, folds weights, launches the Pallas kernel."""
    P = hs.shape[0]
    f32 = jnp.float32
    bf16 = jnp.bfloat16

    tp = _choose_tp(P)
    p_pad = _round_up(P, tp)
    pad = p_pad - P

    # Lane-dense per-pair feature row [rs | hs | ts | 1 | 0...]  (P, 128).
    feat = jnp.concatenate([rs, hs, ts, jnp.ones((P, 1), f32)], axis=1)
    feat = jnp.pad(feat, ((0, pad), (0, FEAT_LANES - feat.shape[1]))).astype(bf16)

    # Stacked head/tail mention tensors (single DMA stream).
    htm = jnp.concatenate([hm, tm], axis=1)                 # (P, 2M, H)
    htm = jnp.pad(htm, ((0, pad), (0, 0), (0, 0))).astype(bf16)
    two_m = htm.shape[1]

    wf, wht, rt, wbl = _prepare_weights(params)

    grid = (p_pad // tp,)
    in_specs = [
        pl.BlockSpec((tp, FEAT_LANES), lambda i: (i, 0)),
        pl.BlockSpec((tp, two_m, HIDDEN), lambda i: (i, 0, 0)),
        # weight slabs are full blocks and grid-invariant (stay resident)
        pl.BlockSpec(wf.shape, lambda i: (0, 0)),
        pl.BlockSpec(wht.shape, lambda i: (0, 0)),
        pl.BlockSpec(rt.shape, lambda i: (0, 0)),
        pl.BlockSpec(wbl.shape, lambda i: (0, 0)),
    ]
    out_specs = pl.BlockSpec((tp, OUT_LANES), lambda i: (i, 0))

    packed = pl.pallas_call(
        _docre_head_kernel,
        out_shape=jax.ShapeDtypeStruct((p_pad, OUT_LANES), jnp.float32),
        grid_spec=pltpu.PrefetchScalarGridSpec(
            num_scalar_prefetch=0,
            grid=grid,
            in_specs=in_specs,
            out_specs=out_specs),
        compiler_params=pltpu.CompilerParams(
            dimension_semantics=("parallel",),
            vmem_limit_bytes=32 * 1024 * 1024),
    )(feat, htm, wf, wht, rt, wbl)

    logits = packed[:P, :NUM_LABELS]

    # ATLoss.get_label (num_labels == -1), done in the wrapper (trivial XLA op):
    # class 0 is the threshold class.
    pos = (logits > logits[:, 0:1]).astype(f32)
    pred = pos.at[:, 0].set((pos.sum(axis=1) == 0.0).astype(f32))
    return logits, pred


# ----------------------------- JAX glue --------------------------------------
def encode_stub(input_ids, attention_mask, params, key):
    # TODO(synk): process_long_input + the pretrained transformer cannot be
    # ported; replaced with a deterministic synthetic encoder of identical shapes.
    seq_out = jnp.tanh(params['emb_table'][input_ids]).astype(jnp.float32)  # (B, C, H)
    b, c = input_ids.shape
    scores = jax.random.normal(key, (b, NUM_HEADS, c, c), jnp.float32)
    scores = jnp.where(attention_mask[:, None, None, :] > 0, scores, -1e9)
    attention = jax.nn.softmax(scores, axis=-1)                             # (B, h, C, C)
    return seq_out, attention


def get_hrt(seq_out, attention, entity_pos, hts, offset=1):
    B, heads, _, c = attention.shape
    hss, tss, rss = [], [], []
    for i in range(B):
        e_embs, e_atts = [], []
        for e in entity_pos[i]:
            if len(e) > 1:
                embs, atts = [], []
                for (start, _end) in e:
                    if start + offset < c:
                        embs.append(seq_out[i, start + offset])
                        atts.append(attention[i, :, start + offset])
                if embs:
                    emb = logsumexp(jnp.stack(embs, 0), axis=0)
                    att = jnp.stack(atts, 0).mean(0)
                else:
                    emb = jnp.zeros((HIDDEN,), jnp.float32)
                    att = jnp.zeros((heads, c), jnp.float32)
            else:
                start, _end = e[0]
                if start + offset < c:
                    emb = seq_out[i, start + offset]
                    att = attention[i, :, start + offset]
                else:
                    emb = jnp.zeros((HIDDEN,), jnp.float32)
                    att = jnp.zeros((heads, c), jnp.float32)
            e_embs.append(emb)
            e_atts.append(att)
        e_embs = jnp.stack(e_embs, 0)                       # (ne, H)
        e_atts = jnp.stack(e_atts, 0)                       # (ne, heads, c)
        ht = jnp.array(hts[i], dtype=jnp.int32)
        hs = e_embs[ht[:, 0]]
        ts = e_embs[ht[:, 1]]
        h_att = e_atts[ht[:, 0]]
        t_att = e_atts[ht[:, 1]]
        ht_att = (h_att * t_att).mean(1)                    # (np, c)
        ht_att = ht_att / (ht_att.sum(1, keepdims=True) + 1e-5)
        rs = ht_att @ seq_out[i]                            # 'ld,rl->rd'
        hss.append(hs); tss.append(ts); rss.append(rs)
    return (jnp.concatenate(hss, 0), jnp.concatenate(rss, 0),
            jnp.concatenate(tss, 0))


def gat_forward(x, adj, gat_params):
    # TODO(synk): the GAT class is not provided in the reference; a standard
    # multi-head graph attention (LeakyReLU scores, edge-weighted softmax,
    # residual) is reconstructed here as plain-JAX glue.
    n_layers = len(gat_params)
    for li, p in enumerate(gat_params):
        outs = []
        for hd in range(p['W'].shape[0]):
            wh = x @ p['W'][hd]                              # (N, dh)
            src = wh @ p['a_src'][hd]                        # (N,)
            dst = wh @ p['a_dst'][hd]                        # (N,)
            e = jax.nn.leaky_relu(src[:, None] + dst[None, :], 0.2)
            e = jnp.where(adj > 0, e, -1e9)
            att = jax.nn.softmax(e, axis=-1)
            att = att * adj                                  # use_edge_weights=True
            att = att / (att.sum(-1, keepdims=True) + 1e-9)
            outs.append(att @ wh)
        out = jnp.concatenate(outs, axis=-1) + x             # residual=True
        x = jax.nn.elu(out) if li < n_layers - 1 else out
    return x


def graph_module(seq_out, adj, entity_pos, gat_params, label_emb, offset=1):
    B, c, _ = seq_out.shape
    num_node = adj.shape[0]
    feats = jnp.zeros((num_node, HIDDEN), jnp.float32)
    # TODO(synk): reference hard-codes 97 label nodes; we use NUM_LABELS.
    feats = feats.at[num_node - NUM_LABELS:].set(label_emb)
    node_offset = 0
    for i in range(B):
        for e in entity_pos[i]:
            for (start, _end) in e:
                if start + offset < c:
                    feats = feats.at[node_offset].set(seq_out[i, start + offset])
                node_offset += 1
        feats = feats.at[node_offset].set(seq_out[i, 0])
        node_offset += 1
    label_embedding = feats[node_offset:node_offset + NUM_LABELS]
    feats = gat_forward(feats, adj, gat_params)

    max_mentions = max(len(e) for ents in entity_pos for e in ents)
    all_entity_embs = []
    node_offset = 0
    for i in range(B):
        for e in entity_pos[i]:
            em = feats[node_offset:node_offset + len(e)]
            if len(e) < max_mentions:
                em = jnp.concatenate(
                    [em, jnp.zeros((max_mentions - len(e), HIDDEN), jnp.float32)], 0)
            all_entity_embs.append(em)
            node_offset += len(e)
        node_offset += 1
    all_entity_embs = jnp.stack(all_entity_embs, 0)          # (nE_total, M, H)
    return all_entity_embs, label_embedding


def docre_forward(input_ids, attention_mask, entity_pos, hts, adj, params, att_key):
    seq_out, attention = encode_stub(input_ids, attention_mask, params, att_key)
    hs, rs, ts = get_hrt(seq_out, attention, entity_pos, hts)
    all_entity_embs, label_embedding = graph_module(
        seq_out, adj, entity_pos, params['gat'], params['label_embedding'])

    # NB: the reference indexes stacked entity embeddings with per-batch-local
    # hts indices (no batch offset); reproduced verbatim.
    all_hts = [pair for batch_hts in hts for pair in batch_hts]
    idx = jnp.array(all_hts, dtype=jnp.int32)
    hm = all_entity_embs[idx[:, 0]]                          # (P, M, H)
    tm = all_entity_embs[idx[:, 1]]

    head_params = dict(params)
    head_params['label_embedding'] = label_embedding
    logits, pred = docre_relation_head(hs, ts, rs, hm, tm, head_params)
    # TODO(synk): ATLoss training branch (labels != None) is omitted; only the
    # inference output (get_label) is produced, matching labels=None.
    return logits, pred


# ----------------------------- params / graph --------------------------------
def init_params(key):
    keys = jax.random.split(key, 16)
    s = 0.05

    def lin(k, out_dim, in_dim):
        return jax.random.normal(k, (out_dim, in_dim), jnp.float32) * s

    params = dict(
        W_q=lin(keys[0], HIDDEN, HIDDEN),
        W_k=lin(keys[1], HIDDEN, HIDDEN),
        linear1_w=lin(keys[2], NUM_LABELS, 2 * HIDDEN),
        linear1_b=jnp.zeros((NUM_LABELS,), jnp.float32),
        linear2_w=lin(keys[3], NUM_LABELS, 2 * NUM_LABELS),
        linear2_b=jnp.zeros((NUM_LABELS,), jnp.float32),
        head_extractor_w=lin(keys[4], EMB_SIZE, 2 * HIDDEN),
        head_extractor_b=jnp.zeros((EMB_SIZE,), jnp.float32),
        tail_extractor_w=lin(keys[5], EMB_SIZE, 2 * HIDDEN),
        tail_extractor_b=jnp.zeros((EMB_SIZE,), jnp.float32),
        bilinear1_w=lin(keys[6], HIDDEN, EMB_SIZE * BLOCK_SIZE),
        bilinear1_b=jnp.zeros((HIDDEN,), jnp.float32),
        bilinear_w=lin(keys[7], NUM_LABELS, 3 * NUM_LABELS),
        bilinear_b=jnp.zeros((NUM_LABELS,), jnp.float32),
        # TODO(synk): pickle-loaded label embedding replaced by deterministic init.
        label_embedding=jax.random.normal(keys[8], (NUM_LABELS, HIDDEN), jnp.float32) * s,
        emb_table=jax.random.normal(keys[9], (VOCAB, HIDDEN), jnp.float32) * 0.5,
    )
    dh = HIDDEN // GAT_HEADS
    gat = []
    for l in range(3):
        k1, k2, k3 = jax.random.split(keys[10 + l], 3)
        gat.append(dict(
            W=jax.random.normal(k1, (GAT_HEADS, HIDDEN, dh), jnp.float32) * s,
            a_src=jax.random.normal(k2, (GAT_HEADS, dh), jnp.float32) * s,
            a_dst=jax.random.normal(k3, (GAT_HEADS, dh), jnp.float32) * s))
    params['gat'] = gat
    return params


def build_graph(entity_pos, num_labels):
    """Dense weighted adjacency matching graph()'s node ordering:
    mentions (per batch, per entity) -> doc node per batch -> label nodes."""
    node_ptr = 0
    per_batch, batch_doc_nodes = [], []
    for ents in entity_pos:
        batch_info = []
        for e in ents:
            ids = list(range(node_ptr, node_ptr + len(e)))
            node_ptr += len(e)
            batch_info.append(ids)
        batch_doc_nodes.append(node_ptr)
        node_ptr += 1
        per_batch.append(batch_info)
    label_nodes = list(range(node_ptr, node_ptr + num_labels))
    num_node = node_ptr + num_labels
    A = np.eye(num_node, dtype=np.float32)                   # self loops
    for bi, batch_info in enumerate(per_batch):
        doc = batch_doc_nodes[bi]
        for ids in batch_info:
            for a in ids:
                A[a, doc] = 1.0
                A[doc, a] = 1.0
                for b in ids:
                    A[a, b] = 1.0
        for ln in label_nodes:
            A[doc, ln] = 1.0
            A[ln, doc] = 1.0
    return jnp.asarray(A), num_node


# --------------------------------- main ---------------------------------------
if __name__ == "__main__":
    key = jax.random.PRNGKey(0)
    k_params, k_ids, k_att = jax.random.split(key, 3)
    params = init_params(k_params)

    input_ids = jax.random.randint(k_ids, (BATCH, SEQ_LEN), 0, VOCAB)
    attention_mask = jnp.ones((BATCH, SEQ_LEN), jnp.float32)

    # entity_pos[batch] = list of entities, each a list of (start, end) mentions
    entity_pos = [
        [[(2, 3), (10, 11)], [(20, 21)], [(30, 31), (40, 41), (50, 52)]],
        [[(5, 6), (15, 16)], [(25, 26)], [(35, 36), (45, 46), (55, 56)]],
    ]
    # hts[batch] = list of [head_entity, tail_entity] pairs
    hts = [
        [[h, t] for h in range(3) for t in range(3) if h != t],
        [[h, t] for h in range(3) for t in range(3) if h != t],
    ]
    num_pairs = sum(len(b) for b in hts)

    adj, num_node = build_graph(entity_pos, NUM_LABELS)

    logits, pred = docre_forward(input_ids, attention_mask, entity_pos, hts,
                                 adj, params, k_att)
    jax.block_until_ready((logits, pred))

    assert logits.shape == (num_pairs, NUM_LABELS)
    assert pred.shape == (num_pairs, NUM_LABELS)
    assert bool(jnp.all(jnp.isfinite(logits)))
    assert bool(jnp.all((pred == 0.0) | (pred == 1.0)))
    print("KERNEL_OK")
</pallas_src>

<mosaic_0001>
module attributes {stable_mosaic.version = 11 : i64} {
  func.func @_docre_head_kernel(%arg0: i32, %arg1: memref<16x128xbf16, #tpu.memory_space<vmem>>, %arg2: memref<16x6x32xbf16, #tpu.memory_space<vmem>>, %arg3: memref<128x192xbf16, #tpu.memory_space<vmem>>, %arg4: memref<64x96xbf16, #tpu.memory_space<vmem>>, %arg5: memref<128x1024xbf16, #tpu.memory_space<vmem>>, %arg6: memref<1024x32xbf16, #tpu.memory_space<vmem>>, %arg7: memref<16x128xf32, #tpu.memory_space<vmem>>) attributes {dimension_semantics = [#tpu.dimension_semantics<parallel>], iteration_bounds = array<i64: 1>, scalar_prefetch = 0 : i64, scratch_operands = 0 : i64, tpu.core_type = #tpu.core_type<tc>, window_params = [{transform_indices = @transform_0, window_bounds = array<i64: 16, 128>}, {transform_indices = @transform_1, window_bounds = array<i64: 16, 6, 32>}, {pipeline_mode = #tpu.pipeline_mode<synchronous>, transform_indices = @transform_2, window_bounds = array<i64: 128, 192>}, {pipeline_mode = #tpu.pipeline_mode<synchronous>, transform_indices = @transform_3, window_bounds = array<i64: 64, 96>}, {pipeline_mode = #tpu.pipeline_mode<synchronous>, transform_indices = @transform_4, window_bounds = array<i64: 128, 1024>}, {pipeline_mode = #tpu.pipeline_mode<synchronous>, transform_indices = @transform_5, window_bounds = array<i64: 1024, 32>}, {transform_indices = @transform_6, window_bounds = array<i64: 16, 128>}]} {
    %c0 = arith.constant 0 : index
    %c0_0 = arith.constant 0 : index
    %0 = vector.load %arg1[%c0, %c0_0] : memref<16x128xbf16, #tpu.memory_space<vmem>>, vector<16x128xbf16>
    %c0_1 = arith.constant 0 : index
    %c0_2 = arith.constant 0 : index
    %c0_3 = arith.constant 0 : index
    %1 = vector.load %arg2[%c0_1, %c0_2, %c0_3] : memref<16x6x32xbf16, #tpu.memory_space<vmem>>, vector<16x6x32xbf16>
    %2 = arith.extf %1 : vector<16x6x32xbf16> to vector<16x6x32xf32>
    %c0_4 = arith.constant 0 : index
    %c0_5 = arith.constant 0 : index
    %3 = vector.load %arg3[%c0_4, %c0_5] : memref<128x192xbf16, #tpu.memory_space<vmem>>, vector<128x192xbf16>
    %cst = arith.constant dense<0.000000e+00> : vector<16x192xf32>
    %4 = tpu.matmul %0, %3, %cst {dimension_numbers = #tpu.dot_dimension_numbers<[1], [0], [0], [1], [0, 0, 1, 1], [], []>} : vector<16x128xbf16>, vector<128x192xbf16>, vector<16x192xf32> -> vector<16x192xf32>
    %5 = vector.extract_strided_slice %4 {offsets = [0, 0], sizes = [16, 32], strides = [1, 1]} : vector<16x192xf32> to vector<16x32xf32>
    %6 = vector.extract_strided_slice %4 {offsets = [0, 32], sizes = [16, 64], strides = [1, 1]} : vector<16x192xf32> to vector<16x64xf32>
    %7 = vector.extract_strided_slice %4 {offsets = [0, 96], sizes = [16, 64], strides = [1, 1]} : vector<16x192xf32> to vector<16x64xf32>
    %8 = vector.extract_strided_slice %4 {offsets = [0, 160], sizes = [16, 32], strides = [1, 1]} : vector<16x192xf32> to vector<16x32xf32>
    %9 = vector.shape_cast %5 : vector<16x32xf32> to vector<16x1x32xf32>
    %10 = vector.broadcast %9 : vector<16x1x32xf32> to vector<16x6x32xf32>
    %11 = arith.mulf %2, %10 : vector<16x6x32xf32>
    %cst_6 = arith.constant dense<0.000000e+00> : vector<16x6xf32>
    %12 = vector.multi_reduction <add>, %11, %cst_6 [2] : vector<16x6x32xf32> to vector<16x6xf32>
    %13 = vector.extract_strided_slice %12 {offsets = [0, 0], sizes = [16, 3], strides = [1, 1]} : vector<16x6xf32> to vector<16x3xf32>
    %cst_7 = arith.constant dense<0xFF800000> : vector<16xf32>
    %14 = vector.multi_reduction <maximumf>, %13, %cst_7 [1] : vector<16x3xf32> to vector<16xf32>
    %cst_8 = arith.constant 0xFF800000 : f32
    %15 = vector.broadcast %cst_8 : f32 to vector<16xf32>
    %16 = arith.maximumf %15, %14 : vector<16xf32>
    %17 = vector.shape_cast %16 : vector<16xf32> to vector<16x1xf32>
    %18 = vector.broadcast %17 : vector<16x1xf32> to vector<16x3xf32>
    %19 = arith.subf %13, %18 : vector<16x3xf32>
    %20 = math.exp %19 : vector<16x3xf32>
    %cst_9 = arith.constant dense<0.000000e+00> : vector<16xf32>
    %21 = vector.multi_reduction <add>, %20, %cst_9 [1] : vector<16x3xf32> to vector<16xf32>
    %22 = vector.shape_cast %21 : vector<16xf32> to vector<16x1xf32>
    %23 = vector.broadcast %22 : vector<16x1xf32> to vector<16x3xf32>
    %24 = arith.divf %20, %23 : vector<16x3xf32>
    %25 = vector.extract_strided_slice %12 {offsets = [0, 3], sizes = [16, 3], strides = [1, 1]} : vector<16x6xf32> to vector<16x3xf32>
    %cst_10 = arith.constant dense<0xFF800000> : vector<16xf32>
    %26 = vector.multi_reduction <maximumf>, %25, %cst_10 [1] : vector<16x3xf32> to vector<16xf32>
    %cst_11 = arith.constant 0xFF800000 : f32
    %27 = vector.broadcast %cst_11 : f32 to vector<16xf32>
    %28 = arith.maximumf %27, %26 : vector<16xf32>
    %29 = vector.shape_cast %28 : vector<16xf32> to vector<16x1xf32>
    %30 = vector.broadcast %29 : vector<16x1xf32> to vector<16x3xf32>
    %31 = arith.subf %25, %30 : vector<16x3xf32>
    %32 = math.exp %31 : vector<16x3xf32>
    %cst_12 = arith.constant dense<0.000000e+00> : vector<16xf32>
    %33 = vector.multi_reduction <add>, %32, %cst_12 [1] : vector<16x3xf32> to vector<16xf32>
    %34 = vector.shape_cast %33 : vector<16xf32> to vector<16x1xf32>
    %35 = vector.broadcast %34 : vector<16x1xf32> to vector<16x3xf32>
    %36 = arith.divf %32, %35 : vector<16x3xf32>
    %37 = vector.shape_cast %24 : vector<16x3xf32> to vector<16x3x1xf32>
    %38 = vector.extract_strided_slice %2 {offsets = [0, 0, 0], sizes = [16, 3, 32], strides = [1, 1, 1]} : vector<16x6x32xf32> to vector<16x3x32xf32>
    %39 = vector.broadcast %37 : vector<16x3x1xf32> to vector<16x3x32xf32>
    %40 = arith.mulf %39, %38 : vector<16x3x32xf32>
    %cst_13 = arith.constant dense<0.000000e+00> : vector<16x32xf32>
    %41 = vector.multi_reduction <add>, %40, %cst_13 [1] : vector<16x3x32xf32> to vector<16x32xf32>
    %42 = vector.shape_cast %36 : vector<16x3xf32> to vector<16x3x1xf32>
    %43 = vector.extract_strided_slice %2 {offsets = [0, 3, 0], sizes = [16, 3, 32], strides = [1, 1, 1]} : vector<16x6x32xf32> to vector<16x3x32xf32>
    %44 = vector.broadcast %42 : vector<16x3x1xf32> to vector<16x3x32xf32>
    %45 = arith.mulf %44, %43 : vector<16x3x32xf32>
    %cst_14 = arith.constant dense<0.000000e+00> : vector<16x32xf32>
    %46 = vector.multi_reduction <add>, %45, %cst_14 [1] : vector<16x3x32xf32> to vector<16x32xf32>
    %c0_15 = arith.constant 0 : index
    %c0_16 = arith.constant 0 : index
    %47 = vector.load %arg4[%c0_15, %c0_16] : memref<64x96xbf16, #tpu.memory_space<vmem>>, vector<64x96xbf16>
    %48 = arith.truncf %41 : vector<16x32xf32> to vector<16x32xbf16>
    %49 = vector.extract_strided_slice %47 {offsets = [0, 0], sizes = [32, 96], strides = [1, 1]} : vector<64x96xbf16> to vector<32x96xbf16>
    %cst_17 = arith.constant dense<0.000000e+00> : vector<16x96xf32>
    %50 = tpu.matmul %48, %49, %cst_17 {dimension_numbers = #tpu.dot_dimension_numbers<[1], [0], [0], [1], [0, 0, 1, 1], [], []>} : vector<16x32xbf16>, vector<32x96xbf16>, vector<16x96xf32> -> vector<16x96xf32>
    %51 = arith.truncf %46 : vector<16x32xf32> to vector<16x32xbf16>
    %52 = vector.extract_strided_slice %47 {offsets = [32, 0], sizes = [32, 96], strides = [1, 1]} : vector<64x96xbf16> to vector<32x96xbf16>
    %cst_18 = arith.constant dense<0.000000e+00> : vector<16x96xf32>
    %53 = tpu.matmul %51, %52, %cst_18 {dimension_numbers = #tpu.dot_dimension_numbers<[1], [0], [0], [1], [0, 0, 1, 1], [], []>} : vector<16x32xbf16>, vector<32x96xbf16>, vector<16x96xf32> -> vector<16x96xf32>
    %54 = vector.extract_strided_slice %50 {offsets = [0, 0], sizes = [16, 64], strides = [1, 1]} : vector<16x96xf32> to vector<16x64xf32>
    %55 = arith.addf %54, %6 : vector<16x64xf32>
    %56 = math.tanh %55 : vector<16x64xf32>
    %57 = vector.extract_strided_slice %53 {offsets = [0, 0], sizes = [16, 64], strides = [1, 1]} : vector<16x96xf32> to vector<16x64xf32>
    %58 = arith.addf %57, %7 : vector<16x64xf32>
    %59 = math.tanh %58 : vector<16x64xf32>
    %60 = vector.extract_strided_slice %50 {offsets = [0, 64], sizes = [16, 32], strides = [1, 1]} : vector<16x96xf32> to vector<16x32xf32>
    %61 = arith.addf %8, %60 : vector<16x32xf32>
    %62 = vector.extract_strided_slice %53 {offsets = [0, 64], sizes = [16, 32], strides = [1, 1]} : vector<16x96xf32> to vector<16x32xf32>
    %63 = arith.addf %61, %62 : vector<16x32xf32>
    %c0_19 = arith.constant 0 : index
    %c0_20 = arith.constant 0 : index
    %64 = vector.load %arg5[%c0_19, %c0_20] : memref<128x1024xbf16, #tpu.memory_space<vmem>>, vector<128x1024xbf16>
    %65 = arith.truncf %56 : vector<16x64xf32> to vector<16x64xbf16>
    %66 = vector.extract_strided_slice %64 {offsets = [0, 0], sizes = [64, 1024], strides = [1, 1]} : vector<128x1024xbf16> to vector<64x1024xbf16>
    %cst_21 = arith.constant dense<0.000000e+00> : vector<16x1024xf32>
    %67 = tpu.matmul %65, %66, %cst_21 {dimension_numbers = #tpu.dot_dimension_numbers<[1], [0], [0], [1], [0, 0, 1, 1], [], []>} : vector<16x64xbf16>, vector<64x1024xbf16>, vector<16x1024xf32> -> vector<16x1024xf32>
    %68 = arith.truncf %59 : vector<16x64xf32> to vector<16x64xbf16>
    %69 = vector.extract_strided_slice %64 {offsets = [64, 0], sizes = [64, 1024], strides = [1, 1]} : vector<128x1024xbf16> to vector<64x1024xbf16>
    %cst_22 = arith.constant dense<0.000000e+00> : vector<16x1024xf32>
    %70 = tpu.matmul %68, %69, %cst_22 {dimension_numbers = #tpu.dot_dimension_numbers<[1], [0], [0], [1], [0, 0, 1, 1], [], []>} : vector<16x64xbf16>, vector<64x1024xbf16>, vector<16x1024xf32> -> vector<16x1024xf32>
    %71 = arith.mulf %67, %70 : vector<16x1024xf32>
    %72 = arith.truncf %71 : vector<16x1024xf32> to vector<16x1024xbf16>
    %c0_23 = arith.constant 0 : index
    %c0_24 = arith.constant 0 : index
    %73 = vector.load %arg6[%c0_23, %c0_24] : memref<1024x32xbf16, #tpu.memory_space<vmem>>, vector<1024x32xbf16>
    %cst_25 = arith.constant dense<0.000000e+00> : vector<16x32xf32>
    %74 = tpu.matmul %72, %73, %cst_25 {dimension_numbers = #tpu.dot_dimension_numbers<[1], [0], [0], [1], [0, 0, 1, 1], [], []>} : vector<16x1024xbf16>, vector<1024x32xbf16>, vector<16x32xf32> -> vector<16x32xf32>
    %75 = arith.addf %63, %74 : vector<16x32xf32>
    %cst_26 = arith.constant 0.000000e+00 : f32
    %76 = vector.broadcast %cst_26 : f32 to vector<16x96xf32>
    %77 = tpu.concatenate %75, %76 in 1 : vector<16x32xf32>, vector<16x96xf32> -> vector<16x128xf32>
    %c0_27 = arith.constant 0 : index
    %c0_28 = arith.constant 0 : index
    %78 = vector.load %arg7[%c0_27, %c0_28] : memref<16x128xf32, #tpu.memory_space<vmem>>, vector<16x128xf32>
    tpu.vector_store %arg7[%c0_27, %c0_28], %77 {strides = array<i32>} : memref<16x128xf32, #tpu.memory_space<vmem>>, vector<16x128xf32>,
    return
  }
  func.func @transform_0(%arg0: i32) -> (i32, i32) {
    %c0_i32 = arith.constant 0 : i32
    %c0_i32_0 = arith.constant 0 : i32
    return %arg0, %c0_i32 : i32, i32
  }
  func.func @transform_1(%arg0: i32) -> (i32, i32, i32) {
    %c0_i32 = arith.constant 0 : i32
    %c0_i32_0 = arith.constant 0 : i32
    %c0_i32_1 = arith.constant 0 : i32
    return %arg0, %c0_i32, %c0_i32_0 : i32, i32, i32
  }
  func.func @transform_2(%arg0: i32) -> (i32, i32) {
    %c0_i32 = arith.constant 0 : i32
    %c0_i32_0 = arith.constant 0 : i32
    %c0_i32_1 = arith.constant 0 : i32
    return %c0_i32, %c0_i32_0 : i32, i32
  }
  func.func @transform_3(%arg0: i32) -> (i32, i32) {
    %c0_i32 = arith.constant 0 : i32
    %c0_i32_0 = arith.constant 0 : i32
    %c0_i32_1 = arith.constant 0 : i32
    return %c0_i32, %c0_i32_0 : i32, i32
  }
  func.func @transform_4(%arg0: i32) -> (i32, i32) {
    %c0_i32 = arith.constant 0 : i32
    %c0_i32_0 = arith.constant 0 : i32
    %c0_i32_1 = arith.constant 0 : i32
    return %c0_i32, %c0_i32_0 : i32, i32
  }
  func.func @transform_5(%arg0: i32) -> (i32, i32) {
    %c0_i32 = arith.constant 0 : i32
    %c0_i32_0 = arith.constant 0 : i32
    %c0_i32_1 = arith.constant 0 : i32
    return %c0_i32, %c0_i32_0 : i32, i32
  }
  func.func @transform_6(%arg0: i32) -> (i32, i32) {
    %c0_i32 = arith.constant 0 : i32
    %c0_i32_0 = arith.constant 0 : i32
    return %arg0, %c0_i32 : i32, i32
  }
}

</mosaic_0001>

<bundles_post_ra>
// kernel: tpu_custom_call.1
= control target key start
LH: loop header
LB: loop body
LE: loop exit
PB: predicated region body
PF: predicated region fallthrough
CT: control target
= control target key end

     0   :  { %v5454_v2 = vmov 0   ;;  %s5447_s0 = inlined_call_operand.vmem [shape: bf16[16,128], index: 0, kind: input, shape index: {}]   ;;  %s5448_s1 = inlined_call_operand.vmem [shape: bf16[16,6,32], index: 1, kind: input, shape index: {}]   ;;  %s5449_s2 = inlined_call_operand.vmem [shape: bf16[128,192], index: 2, kind: input, shape index: {}]   ;;  %s5450_s3 = inlined_call_operand.vmem [shape: bf16[64,96], index: 3, kind: input, shape index: {}]   ;;  %s5451_s4 = inlined_call_operand.vmem [shape: bf16[128,1024], index: 4, kind: input, shape index: {}]   ;;  %s5452_s5 = inlined_call_operand.vmem [shape: bf16[1024,32], index: 5, kind: input, shape index: {}]   ;;  %s5453_s6 = inlined_call_operand.hbm [shape: f32[16,128], index: 6, kind: output, shape index: {}]  }
   0x1   :  { %v3872_v0 = vld [vmem:[%s5449_s2 + $0x4] ss:$8 sps:$4 sm:$0xff]   ;;  %v3874_v1 = vld [vmem:[%s5449_s2] ss:$8 sps:$4 sm:$0xff]   ;;  %193 = vmatprep.mubr.bf16.mxu0 %v5454_v2  ;;  %3871 = vset.pattern.permute.xlu1 %v5454_v2  ;;  %v3875_v3 = vld [vmem:[%s5449_s2 + $0x14] ss:$8 sps:$4 sm:$0xff]  }
   0x2   :  { %161 = vmatprep.subr.bf16.mxu0 %v3872_v0  ;;  %3870 = vset.pattern.permute.xlu0 %v5454_v2  ;;  %v3877_v4 = vld [vmem:[%s5449_s2 + $0x10] ss:$8 sps:$4 sm:$0xff]   ;;  %v3878_v5 = vld [vmem:[%s5449_s2 + $0x24] ss:$8 sps:$4 sm:$0xff]   ;;  %v3880_v6 = vld [vmem:[%s5449_s2 + $0x20] ss:$8 sps:$4 sm:$0xff]  }
   0x3   :  { %162 = vmatpush1.bf16.msra.mxu0 %v3874_v1  ;;  %v3881_v7 = vld [vmem:[%s5449_s2 + $0x34] ss:$8 sps:$4 sm:$0xff]   ;;  %v3883_v8 = vld [vmem:[%s5449_s2 + $0x30] ss:$8 sps:$4 sm:$0xff]   ;;  %v3884_v9 = vld [vmem:[%s5449_s2 + $0x44] ss:$8 sps:$4 sm:$0xff]  }
   0x4   :  { %163 = vmatprep.subr.bf16.mxu0 %v3875_v3  ;;  %v3886_v10 = vld [vmem:[%s5449_s2 + $0x40] ss:$8 sps:$4 sm:$0xff]   ;;  %v3887_v11 = vld [vmem:[%s5449_s2 + $0x54] ss:$8 sps:$4 sm:$0xff]   ;;  %v3889_v12 = vld [vmem:[%s5449_s2 + $0x50] ss:$8 sps:$4 sm:$0xff]  }
   0x5   :  { %v3890_v13 = vld [vmem:[%s5449_s2 + $0x64] ss:$8 sps:$4 sm:$0xff]   ;;  %v3892_v14 = vld [vmem:[%s5449_s2 + $0x60] ss:$8 sps:$4 sm:$0xff]   ;;  %v3893_v15 = vld [vmem:[%s5449_s2 + $0x74] ss:$8 sps:$4 sm:$0xff]  }
   0x6   :  { %v3895_v16 = vld [vmem:[%s5449_s2 + $0x70] ss:$8 sps:$4 sm:$0xff]   ;;  %v3896_v17 = vld [vmem:[%s5447_s0] sm:$0xff]  }
   0x7   :  { %164 = vmatpush1.bf16.msra.mxu0 %v3877_v4 }
   0x8   :  { %165 = vmatprep.subr.bf16.mxu0 %v3878_v5 }
   0xb   :  { %166 = vmatpush1.bf16.msra.mxu0 %v3880_v6 }
   0xc   :  { %167 = vmatprep.subr.bf16.mxu0 %v3881_v7 }
   0xf   :  { %168 = vmatpush1.bf16.msra.mxu0 %v3883_v8 }
  0x10   :  { %169 = vmatprep.subr.bf16.mxu0 %v3884_v9 }
  0x13   :  { %170 = vmatpush1.bf16.msra.mxu0 %v3886_v10 }
  0x14   :  { %171 = vmatprep.subr.bf16.mxu0 %v3887_v11 }
  0x17   :  { %172 = vmatpush1.bf16.msra.mxu0 %v3889_v12 }
  0x18   :  { %173 = vmatprep.subr.bf16.mxu0 %v3890_v13 }
  0x1b   :  { %174 = vmatpush1.bf16.msra.mxu0 %v3892_v14 }
  0x1c   :  { %175 = vmatprep.subr.bf16.mxu0 %v3893_v15 }
  0x1f   :  { %176 = vmatpush1.bf16.msra.mxu0 %v3895_v16 }
  0x22   :  { %194 = vmatmul.mubr.bf16.vlgmr.msra.gmra.mrb[0].mxu0 %v3896_v17 }
  0x23   :  { %2421 = vmatprep.mubr.bf16.mxu0 %v5454_v2 }
  0x24   :  { %11 = vsyncpa [#allocation3], 0  ;;  %v4126_v18 = vmov 1966171168   ;;  %v210_v20 = vlaneseq  ;;  %v27_v25 = vld [vmem:[%s5448_s1] sm:$0x7] }
  0x25   :  { %v208_v19 = vunpack.c.l.s4 %v4126_v18  ;;  %v35_v29 = vld [vmem:[%s5448_s1 + $0x20] sm:$0x7]  ;;  %v28_v30 = vld [vmem:[%s5448_s1 + $0x4] sm:$0x7]  ;;  %v4258_v37 = vunpack.c.l.bf16 %v27_v25  ;;  %vm400_vm0 = vcmask 259072   ;;  %vm531_vm1 = vcmask 1041409  }
  0x26   :  { %v4225_v22 = vshrl.u32 %v210_v20, 7  ;;  %v36_v38 = vld [vmem:[%s5448_s1 + $0x24] sm:$0x7]  ;;  %v4264_v40 = vunpack.c.l.bf16 %v35_v29  ;;  %v4266_v41 = vunpack.c.l.bf16 %v28_v30  ;;  %v29_v49 = vld [vmem:[%s5448_s1 + $0x8] sm:$0x7]  ;;  %vm533_vm2 = vcmask 1042434  }
  0x27   :  { %v209_v21 = vunpack.c.0.s8 %v208_v19  ;;  %5505 = vst [vmem:[#allocation9_spill] sm:$0xff] %v4258_v37  ;;  %v4273_v48 = vunpack.c.l.bf16 %v36_v38  ;;  %v37_v56 = vld [vmem:[%s5448_s1 + $0x28] sm:$0x7]  ;;  %v4287_v59 = vunpack.c.l.bf16 %v29_v49  ;;  %v31_v0 = vld [vmem:[%s5448_s1 + $0x10] sm:$0x7]  ;;  %vm535_vm3 = vcmask 1043459  }
  0x28   :  { %v4250_v32 = vsub.s32 0, %v4225_v22  ;;  %5506 = vst [vmem:[#allocation10_spill] sm:$0xff] %v4264_v40  ;;  %5507 = vst [vmem:[#allocation11_spill] sm:$0xff] %v4266_v41  ;;  %v39_v1 = vld [vmem:[%s5448_s1 + $0x30] sm:$0x7]  ;;  %v4302_v6 = vunpack.c.l.bf16 %v37_v56  ;;  %v4305_v8 = vunpack.c.l.bf16 %v31_v0  ;;  %vm537_vm4 = vcmask 1044484  }
  0x29   :  { %v4228_v23 = vsub.s32 %v209_v21, %v4225_v22  ;;  %5508 = vst [vmem:[#allocation12_spill] sm:$0xff] %v4273_v48  ;;  %5509 = vst [vmem:[#allocation13_spill] sm:$0xff] %v4287_v59  ;;  %v4308_v10 = vunpack.c.l.bf16 %v39_v1  ;;  %v30_v15 = vld [vmem:[%s5448_s1 + $0xc] sm:$0x7]  ;;  %v40_v38 = vld [vmem:[%s5448_s1 + $0x34] sm:$0x7] }
  0x2a   :  { %5510 = vst [vmem:[#allocation14_spill] sm:$0xff] %v4302_v6  ;;  %5511 = vst [vmem:[#allocation15_spill] sm:$0xff] %v4305_v8  ;;  %v38_v17 = vld [vmem:[%s5448_s1 + $0x2c] sm:$0x7]  ;;  %vm539_vm5 = vcmask 1045509   ;;  %vm541_vm6 = vcmask 1046534  }
  0x2b   :  { %5512 = vst [vmem:[#allocation16_spill] sm:$0xff] %v4308_v10  ;;  %vm543_vm7 = vcmask 1047559   ;;  %vm554_vm8 = vcmask 23552   ;;  %vm955_vm9 = vcmask 48152   ;;  %v4527_v2 = vsub.s32 7, %v4225_v22  ;;  %s4128_s13 = smov 32  }
  0x2c   :  { %vm4130_vm10 = vmmov 0   ;;  %vm1453_vm11 = vcmask 256000   ;;  %vm1905_vm12 = vcmask 261120   ;;  %vm2342_vm13 = vcmask 523264  }
  0xf5   :  { %v4230_v24 = vpop.f32.mrb[0].mxu0 }
  0xf6   :  { %5501 = vst [vmem:[#allocation5_spill] sm:$0xff] %v4230_v24  ;;  %v206_v26 = vcombine.high %v4230_v24, %v4230_v24  ;;  %v213_v27 = vrot.slane %v4230_v24, %v4228_v23  ;;  %v4239_v28 = vpop.f32.mrb[1].mxu0 }
  0xf7   :  { %5502 = vst [vmem:[#allocation6_spill] sm:$0xff] %v4239_v28  ;;  %v4247_v31 = vpop.f32.mrb[2].mxu0 }
  0xf8   :  { %5503 = vst [vmem:[#allocation7_spill] sm:$0xff] %v4247_v31  ;;  %v221_v33 = vcombine.high %v213_v27, %v213_v27  ;;  %v255_v34 = vcombine.high %v4247_v31, %v4247_v31  ;;  %v262_v35 = vrot.slane %v4247_v31, %v4228_v23  ;;  %v4256_v36 = vpop.f32.mrb[3].mxu0  ;;  %v229_v39 = vrot.slane %v213_v27, %v4228_v23 }
  0xf9   :  { %5504 = vst [vmem:[#allocation8_spill] sm:$0xff] %v4256_v36  ;;  %v220_v42 = vrot.slane %v206_v26, %v4228_v23  ;;  %v4321_v26 = vunpack.c.l.bf16 %v30_v15  ;;  %v4323_v27 = vunpack.c.l.bf16 %v38_v17 }
  0xfa   :  { %v270_v43 = vcombine.high %v262_v35, %v262_v35  ;;  %v278_v44 = vrot.slane %v262_v35, %v4228_v23  ;;  %v243_v45 = vrot.slane %v221_v33, %v4228_v23  ;;  %v269_v46 = vrot.slane %v255_v34, %v4228_v23  ;;  %v32_v34 = vld [vmem:[%s5448_s1 + $0x14] sm:$0x7] }
  0xfb   :  { %v307_v47 = vrot.slane %v229_v39, %v4250_v32  ;;  %v251_v50 = vcombine.high %v229_v39, %v229_v39  ;;  %v236_v60 = vrot.slane %v220_v42, %v4228_v23  ;;  %v222_v11 = vcombine.high %v220_v42, %v220_v42  ;;  %5513 = vst [vmem:[#allocation17_spill] sm:$0xff] %v4321_v26 }
  0xfc   :  { %v339_v51 = vrot.slane %v278_v44, %v4250_v32  ;;  %v311_v52 = vrot.slane %v243_v45, %v4250_v32  ;;  %v292_v53 = vrot.slane %v270_v43, %v4228_v23  ;;  %v300_v54 = vcombine.high %v278_v44, %v278_v44  ;;  %5514 = vst [vmem:[#allocation18_spill] sm:$0xff] %v4323_v27 }
  0xfd   :  { %v384_v55 = vmul.f32 %v307_v47, %v4258_v37  ;;  %v315_v63 = vrot.slane %v251_v50, %v4250_v32  ;;  %v285_v3 = vrot.slane %v269_v46, %v4228_v23  ;;  %v323_v9 = vrot.slane %v236_v60, %v4250_v32 }
  0xfe   :  { %v392_v57 = vmul.f32 %v339_v51, %v4264_v40  ;;  %v343_v58 = vrot.slane %v292_v53, %v4250_v32  ;;  %v385_v62 = vmul.f32 %v311_v52, %v4266_v41  ;;  %v347_v7 = vrot.slane %v300_v54, %v4250_v32  ;;  %v33_v51 = vld [vmem:[%s5448_s1 + $0x18] sm:$0x7] }
  0xff   :  { %v401_v61 = vsel %vm400_vm0, %v384_v55, 0.0  ;;  %v386_v13 = vmul.f32 %v315_v63, %v4287_v59  ;;  %v355_v14 = vrot.slane %v285_v3, %v4250_v32  ;;  %v253_v16 = vcombine.high %v243_v45, %v243_v45 }
 0x100   :  { %402 = vadd.xlane.f32.xlu0 %v401_v61  ;;  %v425_v4 = vsel %vm400_vm0, %v392_v57, 0.0  ;;  %v393_v5 = vmul.f32 %v343_v58, %v4273_v48  ;;  %v404_v12 = vsel %vm400_vm0, %v385_v62, 0.0  ;;  %v394_v19 = vmul.f32 %v347_v7, %v4302_v6  ;;  %v42_v7 = vld [vmem:[%s5448_s1 + $0x3c] sm:$0x7] }
 0x101   :  { %426 = vadd.xlane.f32.xlu1 %v425_v4  ;;  %v302_v21 = vcombine.high %v292_v53, %v292_v53  ;;  %v271_v25 = vcombine.high %v269_v46, %v269_v46  ;;  %v407_v29 = vsel %vm400_vm0, %v386_v13, 0.0  ;;  %v388_v30 = vmul.f32 %v323_v9, %v4305_v8 }
 0x102   :  { %v428_v18 = vsel %vm400_vm0, %v393_v5, 0.0  ;;  %v319_v33 = vrot.slane %v253_v16, %v4250_v32  ;;  %v250_v35 = vrot.slane %v222_v11, %v4228_v23  ;;  %v431_v39 = vsel %vm400_vm0, %v394_v19, 0.0 }
 0x103   :  { %v396_v42 = vmul.f32 %v355_v14, %v4308_v10  ;;  %v351_v43 = vrot.slane %v302_v21, %v4250_v32  ;;  %v299_v44 = vrot.slane %v271_v25, %v4228_v23  ;;  %v4339_v45 = vunpack.c.l.bf16 %v32_v34  ;;  %v41_v23 = vld [vmem:[%s5448_s1 + $0x38] sm:$0x7] }
 0x104   :  { %405 = vadd.xlane.f32.xlu0 %v404_v12  ;;  %v4341_v46 = vunpack.c.l.bf16 %v40_v38  ;;  %v413_v47 = vsel %vm400_vm0, %v388_v30, 0.0  ;;  %v387_v49 = vmul.f32 %v319_v33, %v4321_v26  ;;  %v327_v50 = vrot.slane %v250_v35, %v4250_v32 }
 0x105   :  { %429 = vadd.xlane.f32.xlu1 %v428_v18  ;;  %5515 = vst [vmem:[#allocation19_spill] sm:$0xff] %v4339_v45  ;;  %v252_v52 = vcombine.high %v236_v60, %v236_v60  ;;  %v437_v53 = vsel %vm400_vm0, %v396_v42, 0.0  ;;  %v395_v54 = vmul.f32 %v351_v43, %v4323_v27  ;;  %v359_v55 = vrot.slane %v299_v44, %v4250_v32 }
 0x106   :  { %5516 = vst [vmem:[#allocation20_spill] sm:$0xff] %v4341_v46  ;;  %v301_v56 = vcombine.high %v285_v3, %v285_v3  ;;  %v4355_v57 = vunpack.c.l.bf16 %v33_v51  ;;  %v4357_v58 = vunpack.c.l.bf16 %v41_v23  ;;  %v410_v61 = vsel %vm400_vm0, %v387_v49, 0.0  ;;  %v34_v3 = vld [vmem:[%s5448_s1 + $0x1c] sm:$0x7]  ;;  %s4127_s1 = smov 96  }
 0x107   :  { %v389_v60 = vmul.f32 %v327_v50, %v4339_v45  ;;  %v331_v62 = vrot.slane %v252_v52, %v4250_v32  ;;  %v254_v63 = vcombine.high %v250_v35, %v250_v35  ;;  %v434_v0 = vsel %vm400_vm0, %v395_v54, 0.0 }
 0x108   :  { %408 = vadd.xlane.f32.xlu0 %v407_v29  ;;  %5517 = vst [vmem:[#allocation21_spill] sm:$0xff] %v4355_v57  ;;  %5518 = vst [vmem:[#allocation22_spill] sm:$0xff] %v4357_v58  ;;  %v397_v1 = vmul.f32 %v359_v55, %v4341_v46  ;;  %v363_v4 = vrot.slane %v301_v56, %v4250_v32  ;;  %v303_v5 = vcombine.high %v299_v44, %v299_v44 }
 0x109   :  { %432 = vadd.xlane.f32.xlu1 %v431_v39  ;;  %v416_v9 = vsel %vm400_vm0, %v389_v60, 0.0  ;;  %v390_v11 = vmul.f32 %v331_v62, %v4355_v57  ;;  %v4373_v12 = vunpack.c.l.bf16 %v34_v3  ;;  %v335_v13 = vrot.slane %v254_v63, %v4250_v32 }
 0x10a   :  { %v440_v14 = vsel %vm400_vm0, %v397_v1, 0.0  ;;  %v398_v15 = vmul.f32 %v363_v4, %v4357_v58  ;;  %v4378_v16 = vunpack.c.l.bf16 %v42_v7  ;;  %v367_v17 = vrot.slane %v303_v5, %v4250_v32 }
 0x10b   :  { %5519 = vst [vmem:[#allocation23_spill] sm:$0xff] %v4373_v12  ;;  %v419_v18 = vsel %vm400_vm0, %v390_v11, 0.0  ;;  %v391_v19 = vmul.f32 %v335_v13, %v4373_v12  ;;  %v4402_v44 = vand.u32 127, %v210_v20 }
 0x10c   :  { %414 = vadd.xlane.f32.xlu0 %v413_v47  ;;  %5520 = vst [vmem:[#allocation24_spill] sm:$0xff] %v4378_v16  ;;  %v443_v21 = vsel %vm400_vm0, %v398_v15, 0.0  ;;  %v399_v25 = vmul.f32 %v367_v17, %v4378_v16 }
 0x10d   :  { %438 = vadd.xlane.f32.xlu1 %v437_v53  ;;  %v422_v29 = vsel %vm400_vm0, %v391_v19, 0.0  ;;  %v4410_v50 = vsub.s32 %v4402_v44, %v4225_v22 }
 0x10e   :  { %v446_v30 = vsel %vm400_vm0, %v399_v25, 0.0 }
 0x110   :  { %411 = vadd.xlane.f32.xlu0 %v410_v61 }
 0x111   :  { %435 = vadd.xlane.f32.xlu1 %v434_v0 }
 0x114   :  { %417 = vadd.xlane.f32.xlu0 %v416_v9 }
 0x115   :  { %441 = vadd.xlane.f32.xlu1 %v440_v14 }
 0x118   :  { %420 = vadd.xlane.f32.xlu0 %v419_v18 }
 0x119   :  { %444 = vadd.xlane.f32.xlu1 %v443_v21 }
 0x11c   :  { %423 = vadd.xlane.f32.xlu0 %v422_v29 }
 0x11d   :  { %447 = vadd.xlane.f32.xlu1 %v446_v30 }
 0x18d   :  { %v4387_v33 = vpop.xlane.xlu0 %402 }
 0x18e   :  { %v4389_v34 = vpop.xlane.xlu1 %426  ;;  %v470_v54 = vrot.slane %v4387_v33, %v4410_v50 }
 0x18f   :  { %v502_v60 = vrot.slane %v4389_v34, %v4410_v50 }
 0x191   :  { %v4391_v35 = vpop.xlane.xlu0 %405 }
 0x192   :  { %v4393_v38 = vpop.xlane.xlu1 %429  ;;  %v474_v52 = vrot.slane %v4391_v35, %v4410_v50 }
 0x193   :  { %v506_v23 = vrot.slane %v4393_v38, %v4410_v50 }
 0x194   :  { %v532_v63 = vsel %vm531_vm1, %v474_v52, %v470_v54 }
 0x195   :  { %v4395_v39 = vpop.xlane.xlu0 %408  ;;  %v545_v0 = vsel %vm531_vm1, %v506_v23, %v502_v60 }
 0x196   :  { %v4397_v42 = vpop.xlane.xlu1 %432  ;;  %v478_v20 = vrot.slane %v4395_v39, %v4410_v50 }
 0x197   :  { %v510_v55 = vrot.slane %v4397_v42, %v4410_v50 }
 0x198   :  { %v534_v1 = vsel %vm533_vm2, %v478_v20, %v532_v63 }
 0x199   :  { %v4399_v43 = vpop.xlane.xlu0 %414  ;;  %v546_v3 = vsel %vm533_vm2, %v510_v55, %v545_v0 }
 0x19a   :  { %v4404_v47 = vpop.xlane.xlu1 %438  ;;  %v486_v11 = vrot.slane %v4399_v43, %v4410_v50 }
 0x19b   :  { %v518_v17 = vrot.slane %v4404_v47, %v4410_v50 }
 0x19d   :  { %v4406_v49 = vpop.xlane.xlu0 %411 }
 0x19e   :  { %v4412_v51 = vpop.xlane.xlu1 %435  ;;  %v482_v56 = vrot.slane %v4406_v49, %v4410_v50 }
 0x19f   :  { %v514_v62 = vrot.slane %v4412_v51, %v4410_v50 }
 0x1a0   :  { %v536_v5 = vsel %vm535_vm3, %v482_v56, %v534_v1 }
 0x1a1   :  { %v4420_v53 = vpop.xlane.xlu0 %417  ;;  %v547_v13 = vsel %vm535_vm3, %v514_v62, %v546_v3  ;;  %v538_v21 = vsel %vm537_vm4, %v486_v11, %v536_v5  ;;  %v4475_v3 = vsub.s32 1, %v4225_v22  ;;  %v4478_v5 = vsub.s32 2, %v4225_v22 }
 0x1a2   :  { %v4428_v61 = vpop.xlane.xlu1 %441  ;;  %v490_v7 = vrot.slane %v4420_v53, %v4410_v50  ;;  %v548_v52 = vsel %vm537_vm4, %v518_v17, %v547_v13  ;;  %v4492_v17 = vsub.s32 4, %v4225_v22 }
 0x1a3   :  { %v522_v14 = vrot.slane %v4428_v61, %v4410_v50 }
 0x1a4   :  { %v540_v30 = vsel %vm539_vm5, %v490_v7, %v538_v21  ;;  %v4481_v7 = vsub.s32 3, %v4225_v22 }
 0x1a5   :  { %v4437_v4 = vpop.xlane.xlu0 %420  ;;  %v549_v54 = vsel %vm539_vm5, %v522_v14, %v548_v52 }
 0x1a6   :  { %v4443_v9 = vpop.xlane.xlu1 %444  ;;  %v494_v15 = vrot.slane %v4437_v4, %v4410_v50 }
 0x1a7   :  { %v526_v18 = vrot.slane %v4443_v9, %v4410_v50 }
 0x1a8   :  { %v542_v20 = vsel %vm541_vm6, %v494_v15, %v540_v30 }
 0x1a9   :  { %v4456_v19 = vpop.xlane.xlu0 %423  ;;  %v550_v56 = vsel %vm541_vm6, %v526_v18, %v549_v54  ;;  %v4502_v54 = vsub.s32 5, %v4225_v22 }
 0x1aa   :  { %v498_v25 = vrot.slane %v4456_v19, %v4410_v50  ;;  %v4461_v29 = vpop.xlane.xlu1 %447 }
 0x1ab   :  { %v530_v23 = vrot.slane %v4461_v29, %v4410_v50 }
 0x1ac   :  { %v544_v55 = vsel %vm543_vm7, %v498_v25, %v542_v20 }
 0x1ad   :  { %v555_v60 = vsel %vm554_vm8, %v544_v55, -inf  ;;  %v551_v62 = vsel %vm543_vm7, %v530_v23, %v550_v56  ;;  %v956_v0 = vsel %vm955_vm9, %v544_v55, -inf }
 0x1ae   :  { %556 = vmax.xlane.f32.xlu0 %v555_v60  ;;  %v558_v63 = vsel %vm554_vm8, %v551_v62, -inf  ;;  %v959_v1 = vsel %vm955_vm9, %v551_v62, -inf }
 0x1af   :  { %559 = vmax.xlane.f32.xlu1 %v558_v63  ;;  %v4510_v63 = vsub.s32 6, %v4225_v22 }
 0x1b2   :  { %957 = vmax.xlane.f32.xlu0 %v956_v0 }
 0x1b3   :  { %960 = vmax.xlane.f32.xlu1 %v959_v1 }
 0x23b   :  { %v4483_v11 = vpop.xlane.xlu0 %556 }
 0x23c   :  { %v566_v13 = vrot.slane %v4483_v11, %v4250_v32  ;;  %v570_v14 = vrot.slane %v4483_v11, %v4475_v3  ;;  %v574_v15 = vrot.slane %v4483_v11, %v4478_v5  ;;  %v578_v25 = vrot.slane %v4483_v11, %v4481_v7  ;;  %v4499_v20 = vpop.xlane.xlu1 %559 }
 0x23d   :  { %v582_v55 = vrot.slane %v4483_v11, %v4492_v17  ;;  %v614_v62 = vrot.slane %v4499_v20, %v4492_v17  ;;  %v618_v0 = vrot.slane %v4499_v20, %v4502_v54 }
 0x23e   :  { %v643_v18 = vsub.f32 %v4387_v33, %v566_v13  ;;  %v644_v21 = vsub.f32 %v4391_v35, %v570_v14  ;;  %v645_v30 = vsub.f32 %v4395_v39, %v574_v15  ;;  %v646_v56 = vsub.f32 %v4406_v49, %v578_v25 }
 0x23f   :  { %v655_v1 = vsub.f32 %v4404_v47, %v614_v62  ;;  %v586_v13 = vrot.slane %v4483_v11, %v4502_v54  ;;  %v647_v14 = vsub.f32 %v4399_v43, %v582_v55 }
 0x240   :  { %v659_v52 = vmul.f32 1.442695, %v643_v18  ;;  %v661_v23 = vmul.f32 1.442695, %v644_v21  ;;  %v663_v60 = vmul.f32 1.442695, %v645_v30  ;;  %v622_v18 = vrot.slane %v4499_v20, %v4510_v63 }
 0x241   :  { %v665_v15 = vmul.f32 1.442695, %v646_v56  ;;  %v656_v21 = vsub.f32 %v4428_v61, %v618_v0  ;;  %v683_v25 = vmul.f32 1.442695, %v655_v1  ;;  %v590_v30 = vrot.slane %v4483_v11, %v4510_v63 }
 0x242   :  { %3965 = vpow2.f32 %v659_v52  ;;  %v648_v52 = vsub.f32 %v4420_v53, %v586_v13  ;;  %v626_v56 = vrot.slane %v4499_v20, %v4527_v2 }
 0x243   :  { %3967 = vpow2.f32 %v661_v23  ;;  %v667_v23 = vmul.f32 1.442695, %v647_v14  ;;  %v685_v0 = vmul.f32 1.442695, %v656_v21  ;;  %v649_v1 = vsub.f32 %v4437_v4, %v590_v30 }
 0x244   :  { %3969 = vpow2.f32 %v663_v60  ;;  %v657_v60 = vsub.f32 %v4443_v9, %v622_v18  ;;  %v669_v13 = vmul.f32 1.442695, %v648_v52  ;;  %v598_v14 = vrot.slane %v4499_v20, %v4250_v32  ;;  %v4550_v52 = vpop.xlane.xlu1 %960 }
 0x245   :  { %3971 = vpow2.f32 %v665_v15  ;;  %v4539_v15 = vpop.xlane.xlu0 %957  ;;  %v658_v16 = vsub.f32 %v4461_v29, %v626_v56  ;;  %v671_v21 = vmul.f32 1.442695, %v649_v1  ;;  %v606_v1 = vrot.slane %v4499_v20, %v4478_v5 }
 0x246   :  { %3973 = vpow2.f32 %v683_v25  ;;  %v687_v40 = vmul.f32 1.442695, %v657_v60  ;;  %v971_v18 = vrot.slane %v4539_v15, %v4475_v3  ;;  %v602_v25 = vrot.slane %v4499_v20, %v4475_v3 }
 0x247   :  { %3975 = vpow2.f32 %v667_v23  ;;  %v651_v30 = vsub.f32 %v4389_v34, %v598_v14  ;;  %v689_v56 = vmul.f32 1.442695, %v658_v16  ;;  %v1007_v16 = vrot.slane %v4550_v52, %v4478_v5 }
 0x248   :  { %3977 = vpow2.f32 %v685_v0  ;;  %v1045_v60 = vsub.f32 %v4391_v35, %v971_v18  ;;  %v1003_v0 = vrot.slane %v4550_v52, %v4475_v3  ;;  %v610_v18 = vrot.slane %v4499_v20, %v4481_v7 }
 0x249   :  { %3979 = vpow2.f32 %v669_v13  ;;  %v652_v13 = vsub.f32 %v4393_v38, %v602_v25  ;;  %v675_v14 = vmul.f32 1.442695, %v651_v30  ;;  %v594_v20 = vrot.slane %v4483_v11, %v4527_v2 }
 0x24a   :  { %3981 = vpow2.f32 %v687_v40  ;;  %v1062_v40 = vmul.f32 1.442695, %v1045_v60  ;;  %v1053_v35 = vsub.f32 %v4393_v38, %v1003_v0  ;;  %v1054_v38 = vsub.f32 %v4397_v42, %v1007_v16 }
 0x24b   :  { %3983 = vpow2.f32 %v671_v21  ;;  %v653_v21 = vsub.f32 %v4397_v42, %v606_v1  ;;  %v677_v25 = vmul.f32 1.442695, %v652_v13  ;;  %v654_v0 = vsub.f32 %v4412_v51, %v610_v18 }
 0x24c   :  { %v4524_v62 = vpop.eup %3965  ;;  %3985 = vpow2.f32 %v689_v56  ;;  %v1011_v56 = vrot.slane %v4550_v52, %v4481_v7  ;;  %v1078_v60 = vmul.f32 1.442695, %v1053_v35  ;;  %v1080_v16 = vmul.f32 1.442695, %v1054_v38 }
 0x24d   :  { %v4529_v55 = vpop.eup %3967  ;;  %708 = vperm.xlu0 %3870, %v4524_v62   ;;  %3987 = vpow2.f32 %v675_v14  ;;  %v679_v1 = vmul.f32 1.442695, %v653_v21  ;;  %v650_v11 = vsub.f32 %v4456_v19, %v594_v20  ;;  %v681_v35 = vmul.f32 1.442695, %v654_v0 }
 0x24e   :  { %711 = vperm.xlu1 %3871, %v4529_v55   ;;  %v4541_v12 = vpop.eup %3969  ;;  %3989 = vpow2.f32 %v1062_v40  ;;  %v1015_v40 = vrot.slane %v4550_v52, %v4492_v17  ;;  %v1055_v42 = vsub.f32 %v4412_v51, %v1011_v56  ;;  %v967_v18 = vrot.slane %v4539_v15, %v4250_v32 }
 0x24f   :  { %v4552_v23 = vpop.eup %3971  ;;  %3991 = vpow2.f32 %v677_v25  ;;  %v1019_v51 = vrot.slane %v4550_v52, %v4502_v54  ;;  %v975_v20 = vrot.slane %v4539_v15, %v4478_v5 }
 0x250   :  { %v4561_v58 = vpop.eup %3973  ;;  %3993 = vpow2.f32 %v1078_v60  ;;  %v1056_v56 = vsub.f32 %v4404_v47, %v1015_v40  ;;  %v1082_v38 = vmul.f32 1.442695, %v1055_v42  ;;  %v673_v60 = vmul.f32 1.442695, %v650_v11 }
 0x251   :  { %v4563_v57 = vpop.eup %3975  ;;  %744 = vperm.xlu0 %3870, %v4561_v58   ;;  %3995 = vpow2.f32 %v679_v1  ;;  %v1044_v0 = vsub.f32 %v4387_v33, %v967_v18  ;;  %v1023_v47 = vrot.slane %v4550_v52, %v4510_v63  ;;  %v1057_v40 = vsub.f32 %v4428_v61, %v1019_v51 }
 0x252   :  { %714 = vperm.xlu1 %3871, %v4541_v12   ;;  %v4573_v30 = vpop.eup %3977  ;;  %3997 = vpow2.f32 %v1080_v16  ;;  %v1084_v42 = vmul.f32 1.442695, %v1056_v56  ;;  %v979_v16 = vrot.slane %v4539_v15, %v4481_v7  ;;  %v1046_v33 = vsub.f32 %v4395_v39, %v975_v20 }
 0x253   :  { %v4575_v46 = vpop.eup %3979  ;;  %3999 = vpow2.f32 %v681_v35  ;;  %v1060_v11 = vmul.f32 1.442695, %v1044_v0  ;;  %v1027_v61 = vrot.slane %v4550_v52, %v4527_v2  ;;  %v1058_v51 = vsub.f32 %v4443_v9, %v1023_v47 }
 0x254   :  { %v4585_v13 = vpop.eup %3981  ;;  %4001 = vpow2.f32 %v1082_v38  ;;  %v1086_v56 = vmul.f32 1.442695, %v1057_v40  ;;  %v983_v38 = vrot.slane %v4539_v15, %v4492_v17  ;;  %v1047_v39 = vsub.f32 %v4406_v49, %v979_v16 }
 0x255   :  { %747 = vperm.xlu0 %3870, %v4573_v30   ;;  %v4587_v14 = vpop.eup %3983  ;;  %4003 = vpow2.f32 %v673_v60  ;;  %v1064_v60 = vmul.f32 1.442695, %v1046_v33  ;;  %v1059_v10 = vsub.f32 %v4461_v29, %v1027_v61  ;;  %v1088_v9 = vmul.f32 1.442695, %v1058_v51 }
 0x256   :  { %717 = vperm.xlu1 %3871, %v4552_v23   ;;  %v4597_v21 = vpop.eup %3985  ;;  %4005 = vpow2.f32 %v1084_v42  ;;  %v987_v47 = vrot.slane %v4539_v15, %v4502_v54  ;;  %v1048_v40 = vsub.f32 %v4399_v43, %v983_v38  ;;  %v1066_v49 = vmul.f32 1.442695, %v1047_v39 }
 0x257   :  { %v4599_v25 = vpop.eup %3987  ;;  %4007 = vpow2.f32 %v1060_v11  ;;  %v1090_v33 = vmul.f32 1.442695, %v1059_v10  ;;  %v999_v61 = vrot.slane %v4550_v52, %v4250_v32  ;;  %v991_v10 = vrot.slane %v4539_v15, %v4510_v63 }
 0x258   :  { %v4609_v1 = vpop.eup %3989  ;;  %4009 = vpow2.f32 %v1086_v56  ;;  %v1049_v29 = vsub.f32 %v4420_v53, %v987_v47  ;;  %v1068_v11 = vmul.f32 1.442695, %v1048_v40  ;;  %v995_v52 = vrot.slane %v4539_v15, %v4527_v2 }
 0x259   :  { %750 = vperm.xlu0 %3870, %v4585_v13   ;;  %v4611_v45 = vpop.eup %3991  ;;  %4011 = vpow2.f32 %v1064_v60  ;;  %v1052_v53 = vsub.f32 %v4389_v34, %v999_v61  ;;  %v1050_v60 = vsub.f32 %v4437_v4, %v991_v10 }
 0x25a   :  { %720 = vperm.xlu1 %3871, %v4563_v57   ;;  %v4621_v35 = vpop.eup %3993  ;;  %4013 = vpow2.f32 %v1088_v9  ;;  %v1070_v56 = vmul.f32 1.442695, %v1049_v29  ;;  %v1051_v34 = vsub.f32 %v4456_v19, %v995_v52 }
 0x25b   :  { %v4623_v18 = vpop.eup %3995  ;;  %4015 = vpow2.f32 %v1066_v49  ;;  %v1076_v9 = vmul.f32 1.442695, %v1052_v53  ;;  %v1072_v49 = vmul.f32 1.442695, %v1050_v60 }
 0x25c   :  { %v4633_v20 = vpop.eup %3997  ;;  %4017 = vpow2.f32 %v1090_v33  ;;  %v1074_v4 = vmul.f32 1.442695, %v1051_v34 }
 0x25d   :  { %753 = vperm.xlu0 %3870, %v4597_v21   ;;  %v4635_v0 = vpop.eup %3999  ;;  %4019 = vpow2.f32 %v1068_v11 }
 0x25e   :  { %723 = vperm.xlu1 %3871, %v4575_v46   ;;  %v4643_v42 = vpop.eup %4001  ;;  %4021 = vpow2.f32 %v1070_v56 }
 0x25f   :  { %v4645_v16 = vpop.eup %4003  ;;  %4023 = vpow2.f32 %v1076_v9 }
 0x260   :  { %v4652_v43 = vpop.eup %4005  ;;  %4025 = vpow2.f32 %v1072_v49 }
 0x261   :  { %1112 = vperm.xlu0 %3870, %v4609_v1   ;;  %5521 = vst [vmem:[#allocation25_spill] sm:$0xff] %v4652_v43  ;;  %v4654_v51 = vpop.eup %4007  ;;  %4027 = vpow2.f32 %v1074_v4 }
 0x262   :  { %726 = vperm.xlu1 %3871, %v4587_v14   ;;  %v4661_v38 = vpop.eup %4009 }
 0x263   :  { %5522 = vst [vmem:[#allocation26_spill] sm:$0xff] %v4661_v38  ;;  %v4663_v39 = vpop.eup %4011 }
 0x264   :  { %v4670_v47 = vpop.eup %4013 }
 0x265   :  { %1136 = vperm.xlu0 %3870, %v4621_v35   ;;  %5523 = vst [vmem:[#allocation27_spill] sm:$0xff] %v4670_v47  ;;  %v4672_v40 = vpop.eup %4015 }
 0x266   :  { %732 = vperm.xlu1 %3871, %v4599_v25   ;;  %v4677_v33 = vpop.eup %4017 }
 0x267   :  { %5524 = vst [vmem:[#allocation28_spill] sm:$0xff] %v4677_v33  ;;  %v4679_v29 = vpop.eup %4019 }
 0x268   :  { %v4683_v15 = vpop.eup %4021 }
 0x269   :  { %1139 = vperm.xlu0 %3870, %v4633_v20   ;;  %v4686_v11 = vpop.eup %4023 }
 0x26a   :  { %735 = vperm.xlu1 %3871, %v4611_v45   ;;  %5525 = vst [vmem:[#allocation29_spill] sm:$0xff] %v4686_v11  ;;  %v4689_v19 = vpop.eup %4025 }
 0x26b   :  { %5526 = vst [vmem:[#allocation30_spill] sm:$0xff] %v4689_v19  ;;  %v4692_v61 = vpop.eup %4027 }
 0x26c   :  { %5527 = vst [vmem:[#allocation31_spill] sm:$0xff] %v4692_v61 }
 0x26d   :  { %1142 = vperm.xlu0 %3870, %v4643_v42  }
 0x26e   :  { %738 = vperm.xlu1 %3871, %v4623_v18  }
 0x271   :  { %1145 = vperm.xlu0 %3870, %v4652_v43  }
 0x272   :  { %741 = vperm.xlu1 %3871, %v4635_v0  }
 0x275   :  { %1148 = vperm.xlu0 %3870, %v4661_v38  }
 0x276   :  { %729 = vperm.xlu1 %3871, %v4645_v16  }
 0x279   :  { %1151 = vperm.xlu0 %3870, %v4670_v47  }
 0x27a   :  { %1109 = vperm.xlu1 %3871, %v4654_v51  }
 0x27d   :  { %1154 = vperm.xlu0 %3870, %v4677_v33  }
 0x27e   :  { %1115 = vperm.xlu1 %3871, %v4663_v39  }
 0x282   :  { %1118 = vperm.xlu1 %3871, %v4672_v40  }
 0x286   :  { %1121 = vperm.xlu1 %3871, %v4679_v29  }
 0x28a   :  { %1124 = vperm.xlu1 %3871, %v4683_v15  }
 0x28e   :  { %1133 = vperm.xlu1 %3871, %v4686_v11  }
 0x292   :  { %1127 = vperm.xlu1 %3871, %v4689_v19  }
 0x296   :  { %1130 = vperm.xlu1 %3871, %v4692_v61  }
 0x2cc   :  { %v709_v53 = vpop.permute.xlu0 %708 }
 0x2cd   :  { %v712_v10 = vpop.permute.xlu1 %711  ;;  %v758_v41 = vrot.slane %v709_v53, %v4410_v50 }
 0x2ce   :  { %v762_v36 = vrot.slane %v712_v10, %v4410_v50 }
 0x2d0   :  { %v745_v60 = vpop.permute.xlu0 %744  ;;  %v819_v38 = vsel %vm531_vm1, %v762_v36, %v758_v41 }
 0x2d1   :  { %v715_v56 = vpop.permute.xlu1 %714 }
 0x2d2   :  { %v766_v31 = vrot.slane %v715_v56, %v4410_v50 }
 0x2d4   :  { %v748_v34 = vpop.permute.xlu0 %747  ;;  %v820_v56 = vsel %vm533_vm2, %v766_v31, %v819_v38 }
 0x2d5   :  { %v718_v52 = vpop.permute.xlu1 %717 }
 0x2d6   :  { %v770_v33 = vrot.slane %v718_v52, %v4410_v50 }
 0x2d8   :  { %v751_v4 = vpop.permute.xlu0 %750  ;;  %v821_v43 = vsel %vm535_vm3, %v770_v33, %v820_v56  ;;  %v1156_v56 = vadd.s32 3, %v4402_v44 }
 0x2d9   :  { %v721_v9 = vpop.permute.xlu1 %720  ;;  %v814_v41 = vrot.slane %v751_v4, %v4410_v50 }
 0x2da   :  { %v774_v47 = vrot.slane %v721_v9, %v4410_v50  ;;  %v810_v9 = vrot.slane %v748_v34, %v4410_v50 }
 0x2dc   :  { %v754_v8 = vpop.permute.xlu0 %753 }
 0x2dd   :  { %v724_v49 = vpop.permute.xlu1 %723  ;;  %v818_v31 = vrot.slane %v754_v8, %v4410_v50 }
 0x2de   :  { %v778_v11 = vrot.slane %v724_v49, %v4410_v50 }
 0x2e0   :  { %v4695_v26 = vpop.permute.xlu0 %1112 }
 0x2e1   :  { %v727_v27 = vpop.permute.xlu1 %726 }
 0x2e4   :  { %v1137_v59 = vpop.permute.xlu0 %1136 }
 0x2e5   :  { %v733_v6 = vpop.permute.xlu1 %732 }
 0x2e6   :  { %v790_v61 = vrot.slane %v733_v6, %v4410_v50 }
 0x2e8   :  { %v1140_v52 = vpop.permute.xlu0 %1139 }
 0x2e9   :  { %v736_v48 = vpop.permute.xlu1 %735 }
 0x2ea   :  { %v794_v28 = vrot.slane %v736_v48, %v4410_v50  ;;  %v806_v48 = vrot.slane %v745_v60, %v4410_v50 }
 0x2ec   :  { %v826_v53 = vsel %vm531_vm1, %v794_v28, %v790_v61  ;;  %v822_v28 = vsel %vm537_vm4, %v774_v47, %v821_v43  ;;  %v1143_v43 = vpop.permute.xlu0 %1142 }
 0x2ed   :  { %v739_v37 = vpop.permute.xlu1 %738 }
 0x2ee   :  { %v798_v24 = vrot.slane %v739_v37, %v4410_v50  ;;  %v782_v37 = vrot.slane %v727_v27, %v4410_v50  ;;  %v823_v27 = vsel %vm539_vm5, %v778_v11, %v822_v28 }
 0x2f0   :  { %v827_v6 = vsel %vm533_vm2, %v798_v24, %v826_v53  ;;  %v824_v33 = vsel %vm541_vm6, %v782_v37, %v823_v27 }
 0x2f1   :  { %v742_v19 = vpop.permute.xlu1 %741 }
 0x2f2   :  { %v802_v10 = vrot.slane %v742_v19, %v4410_v50 }
 0x2f4   :  { %v828_v36 = vsel %vm535_vm3, %v802_v10, %v827_v6 }
 0x2f5   :  { %v829_v19 = vsel %vm537_vm4, %v806_v48, %v828_v36  ;;  %v730_v61 = vpop.permute.xlu1 %729 }
 0x2f6   :  { %v786_v38 = vrot.slane %v730_v61, %v4410_v50  ;;  %v830_v24 = vsel %vm539_vm5, %v810_v9, %v829_v19  ;;  %v1146_v50 = vpop.permute.xlu0 %1145  ;;  %v1159_v9 = vsub.s32 %v1156_v56, %v4225_v22 }
 0x2f7   :  { %v831_v60 = vsel %vm541_vm6, %v814_v41, %v830_v24 }
 0x2f8   :  { %v832_v34 = vsel %vm543_vm7, %v818_v31, %v831_v60  ;;  %v825_v49 = vsel %vm543_vm7, %v786_v38, %v824_v33  ;;  %v1196_v41 = vrot.slane %v1137_v59, %v1159_v9  ;;  %v1200_v61 = vrot.slane %v1140_v52, %v1159_v9 }
 0x2f9   :  { %v1110_v47 = vpop.permute.xlu1 %1109  ;;  %v838_v4 = vsel %vm554_vm8, %v832_v34, 0.0  ;;  %v835_v8 = vsel %vm554_vm8, %v825_v49, 0.0  ;;  %v1164_v27 = vrot.slane %v4695_v26, %v1159_v9  ;;  %v1204_v38 = vrot.slane %v1143_v43, %v1159_v9 }
 0x2fa   :  { %839 = vadd.xlane.f32.xlu0 %v838_v4  ;;  %836 = vadd.xlane.f32.xlu1 %v835_v8  ;;  %v1149_v10 = vpop.permute.xlu0 %1148  ;;  %v1160_v28 = vrot.slane %v1110_v47, %v1159_v9  ;;  %v1208_v33 = vrot.slane %v1146_v50, %v1159_v9 }
 0x2fb   :  { %v1212_v8 = vrot.slane %v1149_v10, %v1159_v9 }
 0x2fc   :  { %v1221_v22 = vsel %vm531_vm1, %v1164_v27, %v1160_v28 }
 0x2fd   :  { %v1116_v11 = vpop.permute.xlu1 %1115 }
 0x2fe   :  { %v1152_v6 = vpop.permute.xlu0 %1151  ;;  %v1168_v31 = vrot.slane %v1116_v11, %v1159_v9 }
 0x2ff   :  { %v1216_v52 = vrot.slane %v1152_v6, %v1159_v9 }
 0x300   :  { %v1222_v11 = vsel %vm533_vm2, %v1168_v31, %v1221_v22 }
 0x301   :  { %v1119_v53 = vpop.permute.xlu1 %1118 }
 0x302   :  { %v1172_v24 = vrot.slane %v1119_v53, %v1159_v9  ;;  %v1155_v34 = vpop.permute.xlu0 %1154 }
 0x303   :  { %v1220_v53 = vrot.slane %v1155_v34, %v1159_v9 }
 0x304   :  { %v1223_v50 = vsel %vm535_vm3, %v1172_v24, %v1222_v11 }
 0x305   :  { %v1122_v48 = vpop.permute.xlu1 %1121 }
 0x306   :  { %v1176_v49 = vrot.slane %v1122_v48, %v1159_v9 }
 0x308   :  { %v1224_v56 = vsel %vm537_vm4, %v1176_v49, %v1223_v50 }
 0x309   :  { %v1125_v37 = vpop.permute.xlu1 %1124 }
 0x30a   :  { %v1180_v59 = vrot.slane %v1125_v37, %v1159_v9 }
 0x30c   :  { %v1225_v37 = vsel %vm539_vm5, %v1180_v59, %v1224_v56 }
 0x30d   :  { %v1134_v36 = vpop.permute.xlu1 %1133 }
 0x30e   :  { %v1192_v19 = vrot.slane %v1134_v36, %v1159_v9 }
 0x310   :  { %v1228_v60 = vsel %vm531_vm1, %v1196_v41, %v1192_v19 }
 0x311   :  { %v1229_v44 = vsel %vm533_vm2, %v1200_v61, %v1228_v60  ;;  %v1128_v4 = vpop.permute.xlu1 %1127 }
 0x312   :  { %v1230_v47 = vsel %vm535_vm3, %v1204_v38, %v1229_v44  ;;  %v1184_v26 = vrot.slane %v1128_v4, %v1159_v9 }
 0x313   :  { %v1231_v43 = vsel %vm537_vm4, %v1208_v33, %v1230_v47 }
 0x314   :  { %v1232_v48 = vsel %vm539_vm5, %v1212_v8, %v1231_v43  ;;  %v1226_v19 = vsel %vm541_vm6, %v1184_v26, %v1225_v37 }
 0x315   :  { %v1131_v36 = vpop.permute.xlu1 %1130  ;;  %v1233_v10 = vsel %vm541_vm6, %v1216_v52, %v1232_v48 }
 0x316   :  { %v1188_v41 = vrot.slane %v1131_v36, %v1159_v9  ;;  %v1234_v6 = vsel %vm543_vm7, %v1220_v53, %v1233_v10 }
 0x317   :  { %v1240_v28 = vsel %vm554_vm8, %v1234_v6, 0.0 }
 0x318   :  { %1241 = vadd.xlane.f32.xlu1 %v1240_v28  ;;  %v1227_v61 = vsel %vm543_vm7, %v1188_v41, %v1226_v19 }
 0x319   :  { %v1237_v31 = vsel %vm554_vm8, %v1227_v61, 0.0 }
 0x31a   :  { %1238 = vadd.xlane.f32.xlu0 %v1237_v31 }
 0x387   :  { %v840_v27 = vpop.xlane.xlu0 %839  ;;  %v837_v38 = vpop.xlane.xlu1 %836 }
 0x388   :  { %v850_v24 = vrot.slane %v837_v38, %v4475_v3  ;;  %v846_v60 = vrot.slane %v837_v38, %v4250_v32  ;;  %v854_v9 = vrot.slane %v837_v38, %v4478_v5  ;;  %v882_v33 = vrot.slane %v840_v27, %v4475_v3 }
 0x389   :  { %v858_v34 = vrot.slane %v837_v38, %v4481_v7  ;;  %v886_v49 = vrot.slane %v840_v27, %v4478_v5  ;;  %v862_v44 = vrot.slane %v837_v38, %v4492_v17  ;;  %v890_v4 = vrot.slane %v840_v27, %v4481_v7 }
 0x38a   :  { %4029 = vrcp.f32 %v850_v24  ;;  %v866_v22 = vrot.slane %v837_v38, %v4502_v54  ;;  %v894_v52 = vrot.slane %v840_v27, %v4492_v17  ;;  %v870_v53 = vrot.slane %v837_v38, %v4510_v63 }
 0x38b   :  { %4031 = vrcp.f32 %v846_v60  ;;  %v898_v48 = vrot.slane %v840_v27, %v4502_v54  ;;  %v902_v37 = vrot.slane %v840_v27, %v4510_v63  ;;  %v906_v19 = vrot.slane %v840_v27, %v4527_v2 }
 0x38c   :  { %4033 = vrcp.f32 %v854_v9 }
 0x38d   :  { %4035 = vrcp.f32 %v882_v33 }
 0x38e   :  { %4037 = vrcp.f32 %v858_v34 }
 0x38f   :  { %4039 = vrcp.f32 %v886_v49 }
 0x390   :  { %4041 = vrcp.f32 %v862_v44 }
 0x391   :  { %4043 = vrcp.f32 %v890_v4 }
 0x392   :  { %4045 = vrcp.f32 %v866_v22 }
 0x393   :  { %4047 = vrcp.f32 %v894_v52 }
 0x394   :  { %v4030_v8 = vpop.eup %4029  ;;  %4049 = vrcp.f32 %v870_v53 }
 0x395   :  { %v4032_v59 = vpop.eup %4031  ;;  %v926_v47 = vmul.f32 %v4030_v8, %v4529_v55  ;;  %4051 = vrcp.f32 %v898_v48 }
 0x396   :  { %v4034_v11 = vpop.eup %4033  ;;  %v924_v26 = vmul.f32 %v4032_v59, %v4524_v62  ;;  %v878_v62 = vrot.slane %v840_v27, %v4250_v32 }
 0x397   :  { %v4036_v43 = vpop.eup %4035  ;;  %1364 = vperm.xlu1 %3871, %v926_v47   ;;  %v928_v50 = vmul.f32 %v4034_v11, %v4541_v12 }
 0x398   :  { %1359 = vperm.xlu0 %3870, %v924_v26   ;;  %v4038_v56 = vpop.eup %4037  ;;  %v942_v55 = vmul.f32 %v4036_v43, %v4611_v45  ;;  %4053 = vrcp.f32 %v878_v62  ;;  %v874_v45 = vrot.slane %v837_v38, %v4527_v2 }
 0x399   :  { %v4040_v36 = vpop.eup %4039  ;;  %v930_v10 = vmul.f32 %v4038_v56, %v4552_v23  ;;  %4055 = vrcp.f32 %v902_v37 }
 0x39a   :  { %v4042_v41 = vpop.eup %4041  ;;  %v944_v12 = vmul.f32 %v4040_v36, %v4623_v18  ;;  %4057 = vrcp.f32 %v874_v45 }
 0x39b   :  { %1369 = vperm.xlu1 %3871, %v928_v50   ;;  %v4044_v6 = vpop.eup %4043  ;;  %v932_v28 = vmul.f32 %v4042_v41, %v4563_v57  ;;  %4059 = vrcp.f32 %v906_v19 }
 0x39c   :  { %1404 = vperm.xlu0 %3870, %v942_v55   ;;  %v4046_v61 = vpop.eup %4045  ;;  %v946_v23 = vmul.f32 %v4044_v6, %v4635_v0 }
 0x39d   :  { %v4048_v31 = vpop.eup %4047  ;;  %v934_v18 = vmul.f32 %v4046_v61, %v4575_v46 }
 0x39e   :  { %v4050_v24 = vpop.eup %4049  ;;  %v948_v38 = vmul.f32 %v4048_v31, %v4561_v58 }
 0x39f   :  { %1374 = vperm.xlu1 %3871, %v930_v10   ;;  %v4052_v9 = vpop.eup %4051  ;;  %v936_v33 = vmul.f32 %v4050_v24, %v4587_v14  ;;  %v5532_v24 = vld [vmem:[#allocation27_spill] sm:$0xff] }
 0x3a0   :  { %1409 = vperm.xlu0 %3870, %v944_v12   ;;  %v950_v49 = vmul.f32 %v4052_v9, %v4573_v30  ;;  %v5528_v12 = vld [vmem:[#allocation25_spill] sm:$0xff] }
 0x3a2   :  { %v4054_v58 = vpop.eup %4053 }
 0x3a3   :  { %1379 = vperm.xlu1 %3871, %v932_v28   ;;  %v4056_v44 = vpop.eup %4055  ;;  %v940_v8 = vmul.f32 %v4054_v58, %v4599_v25  ;;  %v5537_v58 = vld [vmem:[#allocation6_spill] sm:$0xff] }
 0x3a4   :  { %1414 = vperm.xlu0 %3870, %v946_v23   ;;  %v4058_v22 = vpop.eup %4057 }
 0x3a5   :  { %v4773_v60 = vpop.xlane.xlu1 %1241  ;;  %v4060_v59 = vpop.eup %4059  ;;  %v938_v47 = vmul.f32 %v4058_v22, %v4645_v16 }
 0x3a6   :  { %v1284_v34 = vrot.slane %v4773_v60, %v4475_v3  ;;  %v1288_v14 = vrot.slane %v4773_v60, %v4478_v5  ;;  %v1292_v25 = vrot.slane %v4773_v60, %v4481_v7  ;;  %v954_v52 = vmul.f32 %v4060_v59, %v4597_v21 }
 0x3a7   :  { %v4776_v57 = vpop.xlane.xlu0 %1238  ;;  %1384 = vperm.xlu1 %3871, %v934_v18   ;;  %v1296_v16 = vrot.slane %v4773_v60, %v4492_v17  ;;  %v1280_v21 = vrot.slane %v4773_v60, %v4250_v32 }
 0x3a8   :  { %1419 = vperm.xlu0 %3870, %v948_v38   ;;  %v1248_v0 = vrot.slane %v4776_v57, %v4250_v32  ;;  %v1252_v27 = vrot.slane %v4776_v57, %v4475_v3  ;;  %v1256_v46 = vrot.slane %v4776_v57, %v4478_v5  ;;  %v1260_v4 = vrot.slane %v4776_v57, %v4481_v7  ;;  %v5533_v38 = vld [vmem:[#allocation31_spill] sm:$0xff] }
 0x3a9   :  { %v952_v3 = vmul.f32 %v4056_v44, %v4585_v13  ;;  %v1264_v30 = vrot.slane %v4776_v57, %v4492_v17  ;;  %v1268_v13 = vrot.slane %v4776_v57, %v4502_v54  ;;  %v1304_v32 = vrot.slane %v4773_v60, %v4510_v63  ;;  %v5538_v44 = vld [vmem:[#allocation8_spill] sm:$0xff] }
 0x3aa   :  { %4061 = vrcp.f32 %v1248_v0 }
 0x3ab   :  { %1389 = vperm.xlu1 %3871, %v936_v33   ;;  %4063 = vrcp.f32 %v1252_v27  ;;  %v5535_v27 = vld [vmem:[#allocation5_spill] sm:$0xff]  ;;  %v3897_v33 = vld [vmem:[%s5450_s3] sm:$0xff]  }
 0x3ac   :  { %1424 = vperm.xlu0 %3870, %v950_v49   ;;  %4065 = vrcp.f32 %v1256_v46  ;;  %v5536_v46 = vld [vmem:[#allocation7_spill] sm:$0xff]  ;;  %v3898_v49 = vld [vmem:[%s5450_s3 + $0x8] sm:$0xff]  }
 0x3ad   :  { %4067 = vrcp.f32 %v1284_v34  ;;  %v4129_v34 = vmov 0.0  }
 0x3ae   :  { %4069 = vrcp.f32 %v1260_v4  ;;  %3845 = vmatprep.subr.bf16.mxu1 %v4129_v34  ;;  %3849 = vmatprep.mubr.msk.bf16.mxu1 %vm4130_vm10, %v4129_v34 }
 0x3af   :  { %1399 = vperm.xlu1 %3871, %v940_v8   ;;  %4071 = vrcp.f32 %v1288_v14  ;;  %3846 = vmatpush3.bf16.msra.mxu1 %v3897_v33  ;;  %v5539_v14 = vld [vmem:[#allocation11_spill] sm:$0xff]  ;;  %v5547_v33 = vld [vmem:[#allocation16_spill] sm:$0xff] }
 0x3b0   :  { %1429 = vperm.xlu0 %3870, %v952_v3   ;;  %4073 = vrcp.f32 %v1264_v30  ;;  %3847 = vmatprep.subr.bf16.mxu1 %v4129_v34  ;;  %v5540_v3 = vld [vmem:[#allocation9_spill] sm:$0xff] }
 0x3b1   :  { %4075 = vrcp.f32 %v1292_v25 }
 0x3b2   :  { %4077 = vrcp.f32 %v1268_v13 }
 0x3b3   :  { %1394 = vperm.xlu1 %3871, %v938_v47   ;;  %4079 = vrcp.f32 %v1296_v16  ;;  %3848 = vmatpush3.bf16.msra.mxu1 %v3898_v49  ;;  %v5542_v16 = vld [vmem:[#allocation12_spill] sm:$0xff] }
 0x3b4   :  { %v4062_v5 = vpop.eup %4061  ;;  %1434 = vperm.xlu0 %3870, %v954_v52   ;;  %4081 = vrcp.f32 %v1280_v21  ;;  %3853 = vmatprep.subr.bf16.mxu1 %v4129_v34 }
 0x3b5   :  { %v4064_v11 = vpop.eup %4063  ;;  %v1326_v26 = vmul.f32 %v4062_v5, %v4654_v51  ;;  %v1300_v51 = vrot.slane %v4773_v60, %v4502_v54 }
 0x3b6   :  { %v4066_v43 = vpop.eup %4065  ;;  %v1328_v53 = vmul.f32 %v4064_v11, %v4609_v1  ;;  %v1272_v1 = vrot.slane %v4776_v57, %v4510_v63  ;;  %v5541_v11 = vld [vmem:[#allocation13_spill] sm:$0xff] }
 0x3b7   :  { %v4068_v7 = vpop.eup %4067  ;;  %1568 = vperm.xlu1 %3871, %v1326_v26   ;;  %v1330_v50 = vmul.f32 %v4066_v43, %v4663_v39  ;;  %4083 = vrcp.f32 %v1300_v51 }
 0x3b8   :  { %1573 = vperm.xlu0 %3870, %v1328_v53   ;;  %v4070_v48 = vpop.eup %4069  ;;  %v1344_v56 = vmul.f32 %v4068_v7, %v4621_v35  ;;  %4085 = vrcp.f32 %v1272_v1  ;;  %v1276_v35 = vrot.slane %v4776_v57, %v4527_v2  ;;  %v5534_v57 = vld [vmem:[#allocation28_spill] sm:$0xff] }
 0x3b9   :  { %v4072_v17 = vpop.eup %4071  ;;  %v1332_v55 = vmul.f32 %v4070_v48, %v4672_v40  ;;  %4087 = vrcp.f32 %v1304_v32  ;;  %v1308_v40 = vrot.slane %v4773_v60, %v4527_v2  ;;  %v5530_v2 = vld [vmem:[#allocation26_spill] sm:$0xff] }
 0x3ba   :  { %v4074_v39 = vpop.eup %4073  ;;  %v1346_v36 = vmul.f32 %v4072_v17, %v4633_v20  ;;  %4089 = vrcp.f32 %v1276_v35  ;;  %v5543_v17 = vld [vmem:[#allocation17_spill] sm:$0xff] }
 0x3bb   :  { %1578 = vperm.xlu1 %3871, %v1330_v50   ;;  %v4076_v54 = vpop.eup %4075  ;;  %v1334_v62 = vmul.f32 %v4074_v39, %v4679_v29  ;;  %4091 = vrcp.f32 %v1308_v40  ;;  %v5529_v29 = vld [vmem:[#allocation29_spill] sm:$0xff] }
 0x3bc   :  { %1613 = vperm.xlu0 %3870, %v1344_v56   ;;  %v4078_v10 = vpop.eup %4077  ;;  %v1348_v37 = vmul.f32 %v4076_v54, %v4643_v42  ;;  %v5531_v42 = vld [vmem:[#allocation30_spill] sm:$0xff] }
 0x3bd   :  { %v4080_v63 = vpop.eup %4079  ;;  %v1336_v20 = vmul.f32 %v4078_v10, %v4683_v15 }
 0x3be   :  { %v4082_v41 = vpop.eup %4081  ;;  %v1350_v6 = vmul.f32 %v4080_v63, %v5528_v12 }
 0x3bf   :  { %1583 = vperm.xlu1 %3871, %v1332_v55   ;;  %v1342_v28 = vmul.f32 %v4082_v41, %v5529_v29  ;;  %v5544_v55 = vld [vmem:[#allocation14_spill] sm:$0xff]  ;;  %v5545_v41 = vld [vmem:[#allocation15_spill] sm:$0xff] }
 0x3c0   :  { %1618 = vperm.xlu0 %3870, %v1346_v36  }
 0x3c1   :  { %v4084_v45 = vpop.eup %4083 }
 0x3c2   :  { %v4086_v19 = vpop.eup %4085  ;;  %v1352_v61 = vmul.f32 %v4084_v45, %v5530_v2  ;;  %v5546_v45 = vld [vmem:[#allocation18_spill] sm:$0xff] }
 0x3c3   :  { %1588 = vperm.xlu1 %3871, %v1334_v62   ;;  %v4088_v23 = vpop.eup %4087  ;;  %v1338_v31 = vmul.f32 %v4086_v19, %v5531_v42 }
 0x3c4   :  { %1623 = vperm.xlu0 %3870, %v1348_v37   ;;  %v4090_v18 = vpop.eup %4089  ;;  %v1354_v15 = vmul.f32 %v4088_v23, %v5532_v24 }
 0x3c5   :  { %v4092_v60 = vpop.eup %4091  ;;  %v1340_v9 = vmul.f32 %v4090_v18, %v5533_v38 }
 0x3c6   :  { %v1356_v0 = vmul.f32 %v4092_v60, %v5534_v57 }
 0x3c7   :  { %1593 = vperm.xlu1 %3871, %v1336_v20  }
 0x3c8   :  { %1628 = vperm.xlu0 %3870, %v1350_v6  }
 0x3cb   :  { %1608 = vperm.xlu1 %3871, %v1342_v28  }
 0x3cc   :  { %1633 = vperm.xlu0 %3870, %v1352_v61  }
 0x3cf   :  { %1598 = vperm.xlu1 %3871, %v1338_v31  }
 0x3d0   :  { %1638 = vperm.xlu0 %3870, %v1354_v15  }
 0x3d3   :  { %1603 = vperm.xlu1 %3871, %v1340_v9  }
 0x3d4   :  { %1643 = vperm.xlu0 %3870, %v1356_v0  }
 0x3d7   :  { %2069 = vrot.lane.b32.xlu1 %v5535_v27, %s4127_s1 }
 0x3d8   :  { %2071 = vrot.lane.b32.xlu0 %v5536_v46, %s4127_s1 }
 0x3db   :  { %2081 = vrot.lane.b32.xlu1 %v5535_v27, %s4128_s13 }
 0x3dc   :  { %2083 = vrot.lane.b32.xlu0 %v5537_v58, %s4128_s13 }
 0x3df   :  { %2085 = vrot.lane.b32.xlu1 %v5536_v46, %s4128_s13 }
 0x3e0   :  { %2087 = vrot.lane.b32.xlu0 %v5538_v44, %s4128_s13 }
 0x416   :  { %v1365_v4 = vpop.permute.xlu1 %1364 }
 0x417   :  { %v1360_v8 = vpop.permute.xlu0 %1359  ;;  %v1438_v22 = vmul.f32 %v1365_v4, %v5539_v14 }
 0x418   :  { %v1437_v59 = vmul.f32 %v1360_v8, %v5540_v3 }
 0x419   :  { %v1461_v30 = vsel %vm1453_vm11, %v1438_v22, 0.0 }
 0x41a   :  { %v1454_v47 = vsel %vm1453_vm11, %v1437_v59, 0.0  ;;  %v1462_v25 = vrot.slane %v1461_v30, 4  ;;  %v1370_v52 = vpop.permute.xlu1 %1369 }
 0x41b   :  { %v1455_v5 = vrot.slane %v1454_v47, 4  ;;  %v1405_v13 = vpop.permute.xlu0 %1404  ;;  %v1439_v26 = vmul.f32 %v1370_v52, %v5541_v11 }
 0x41c   :  { %v1446_v43 = vmul.f32 %v1405_v13, %v5542_v16  ;;  %v1463_v53 = vadd.f32 %v1462_v25, %v1461_v30 }
 0x41d   :  { %v1468_v7 = vsel %vm1453_vm11, %v1439_v26, 0.0  ;;  %v1456_v21 = vadd.f32 %v1455_v5, %v1454_v47 }
 0x41e   :  { %v1517_v50 = vsel %vm1453_vm11, %v1446_v43, 0.0  ;;  %v1469_v51 = vrot.slane %v1468_v7, 4  ;;  %v1375_v48 = vpop.permute.xlu1 %1374  ;;  %v1464_v39 = vrot.slane %v1463_v53, 2 }
 0x41f   :  { %v1410_v56 = vpop.permute.xlu0 %1409  ;;  %v1440_v1 = vmul.f32 %v1375_v48, %v5543_v17  ;;  %v1518_v36 = vrot.slane %v1517_v50, 4  ;;  %v1457_v35 = vrot.slane %v1456_v21, 2 }
 0x420   :  { %v1447_v32 = vmul.f32 %v1410_v56, %v5544_v55  ;;  %v1470_v62 = vadd.f32 %v1469_v51, %v1468_v7  ;;  %v1465_v28 = vadd.f32 %v1464_v39, %v1463_v53  ;;  %v5548_v53 = vld [vmem:[#allocation19_spill] sm:$0xff]  ;;  %v5549_v56 = vld [vmem:[#allocation20_spill] sm:$0xff] }
 0x421   :  { %v1475_v54 = vsel %vm1453_vm11, %v1440_v1, 0.0  ;;  %v1519_v19 = vadd.f32 %v1518_v36, %v1517_v50  ;;  %v1458_v61 = vadd.f32 %v1457_v35, %v1456_v21 }
 0x422   :  { %v1524_v40 = vsel %vm1453_vm11, %v1447_v32, 0.0  ;;  %v1476_v10 = vrot.slane %v1475_v54, 4  ;;  %v1380_v37 = vpop.permute.xlu1 %1379  ;;  %v1471_v23 = vrot.slane %v1470_v62, 2  ;;  %v1466_v9 = vrot.slane %v1465_v28, 1 }
 0x423   :  { %v1525_v63 = vrot.slane %v1524_v40, 4  ;;  %v1415_v20 = vpop.permute.xlu0 %1414  ;;  %v1441_v12 = vmul.f32 %v1380_v37, %v5545_v41  ;;  %v1520_v57 = vrot.slane %v1519_v19, 2  ;;  %v1459_v27 = vrot.slane %v1458_v61, 1 }
 0x424   :  { %v1477_v6 = vadd.f32 %v1476_v10, %v1475_v54  ;;  %v1448_v29 = vmul.f32 %v1415_v20, %v5546_v45  ;;  %v1472_v46 = vadd.f32 %v1471_v23, %v1470_v62  ;;  %v1467_v25 = vadd.f32 %v1466_v9, %v1465_v28  ;;  %v5550_v54 = vld [vmem:[#allocation21_spill] sm:$0xff] }
 0x425   :  { %v1482_v2 = vsel %vm1453_vm11, %v1441_v12, 0.0  ;;  %v1526_v18 = vadd.f32 %v1525_v63, %v1524_v40  ;;  %v1521_v52 = vadd.f32 %v1520_v57, %v1519_v19  ;;  %v1460_v26 = vadd.f32 %v1459_v27, %v1458_v61 }
 0x426   :  { %v1531_v42 = vsel %vm1453_vm11, %v1448_v29, 0.0  ;;  %v1385_v31 = vpop.permute.xlu1 %1384  ;;  %v1478_v24 = vrot.slane %v1477_v6, 2  ;;  %v1483_v38 = vrot.slane %v1482_v2, 4  ;;  %v1473_v43 = vrot.slane %v1472_v46, 1 }
 0x427   :  { %v1532_v15 = vrot.slane %v1531_v42, 4  ;;  %v1420_v60 = vpop.permute.xlu0 %1419  ;;  %v1527_v8 = vrot.slane %v1526_v18, 2  ;;  %v1442_v7 = vmul.f32 %v1385_v31, %v5548_v53  ;;  %v1831_v62 = vpack.c.bf16 %v1467_v25, %v1467_v25  ;;  %v5551_v31 = vld [vmem:[#allocation22_spill] sm:$0xff] }
 0x428   :  { %v1449_v49 = vmul.f32 %v1420_v60, %v5547_v33  ;;  %v1479_v22 = vadd.f32 %v1478_v24, %v1477_v6  ;;  %v1484_v59 = vadd.f32 %v1483_v38, %v1482_v2  ;;  %v1522_v40 = vrot.slane %v1521_v52, 1  ;;  %v5552_v24 = vld [vmem:[#allocation10_spill] sm:$0xff] }
 0x429   :  { %v1533_v0 = vadd.f32 %v1532_v15, %v1531_v42  ;;  %v1528_v50 = vadd.f32 %v1527_v8, %v1526_v18  ;;  %v1489_v36 = vsel %vm1453_vm11, %v1442_v7, 0.0  ;;  %v1830_v63 = vpack.c.bf16 %v1460_v26, %v1460_v26 }
 0x42a   :  { %v1390_v4 = vpop.permute.xlu1 %1389  ;;  %v1538_v47 = vsel %vm1453_vm11, %v1449_v49, 0.0  ;;  %v1480_v51 = vrot.slane %v1479_v22, 1  ;;  %v1485_v48 = vrot.slane %v1484_v59, 2  ;;  %v1490_v37 = vrot.slane %v1489_v36, 4 }
 0x42b   :  { %v1425_v30 = vpop.permute.xlu0 %1424  ;;  %v1534_v5 = vrot.slane %v1533_v0, 2  ;;  %v1539_v13 = vrot.slane %v1538_v47, 4  ;;  %v1443_v35 = vmul.f32 %v1390_v4, %v5550_v54  ;;  %v1474_v20 = vadd.f32 %v1473_v43, %v1472_v46 }
 0x42c   :  { %v1450_v1 = vmul.f32 %v1425_v30, %v5549_v56  ;;  %v1529_v6 = vrot.slane %v1528_v50, 1  ;;  %v1481_v29 = vadd.f32 %v1480_v51, %v1479_v22  ;;  %v1486_v28 = vadd.f32 %v1485_v48, %v1484_v59 }
 0x42d   :  { %v1540_v39 = vadd.f32 %v1539_v13, %v1538_v47  ;;  %v1535_v10 = vadd.f32 %v1534_v5, %v1533_v0  ;;  %v1496_v19 = vsel %vm1453_vm11, %v1443_v35, 0.0  ;;  %v1491_v42 = vadd.f32 %v1490_v37, %v1489_v36  ;;  %v5553_v13 = vld [vmem:[#allocation24_spill] sm:$0xff] }
 0x42e   :  { %v1400_v21 = vpop.permute.xlu1 %1399  ;;  %v1545_v12 = vsel %vm1453_vm11, %v1450_v1, 0.0  ;;  %v1863_v60 = vunpack.c.l.b16 %v1831_v62  ;;  %v1523_v38 = vadd.f32 %v1522_v40, %v1521_v52  ;;  %v1862_v0 = vunpack.c.l.b16 %v1830_v63 }
 0x42f   :  { %v1430_v32 = vpop.permute.xlu0 %1429  ;;  %v1541_v23 = vrot.slane %v1540_v39, 2  ;;  %v1445_v15 = vmul.f32 %v1400_v21, %v5552_v24  ;;  %v1536_v9 = vrot.slane %v1535_v10, 1  ;;  %v1546_v57 = vrot.slane %v1545_v12, 4 }
 0x430   :  { %v1451_v18 = vmul.f32 %v1430_v32, %v5551_v31  ;;  %v1497_v27 = vrot.slane %v1496_v19, 4  ;;  %v1832_v4 = vpack.c.bf16 %v1474_v20, %v1474_v20  ;;  %v1530_v8 = vadd.f32 %v1529_v6, %v1528_v50  ;;  %v5554_v32 = vld [vmem:[#allocation23_spill] sm:$0xff] }
 0x431   :  { %v1510_v49 = vsel %vm1453_vm11, %v1445_v15, 0.0  ;;  %v1833_v22 = vpack.c.bf16 %v1481_v29, %v1481_v29  ;;  %v1487_v59 = vrot.slane %v1486_v28, 1  ;;  %v1542_v47 = vadd.f32 %v1541_v23, %v1540_v39 }
 0x432   :  { %v1395_v61 = vpop.permute.xlu1 %1394  ;;  %v1552_v46 = vsel %vm1453_vm11, %v1451_v18, 0.0  ;;  %v1492_v25 = vrot.slane %v1491_v42, 2  ;;  %v1511_v5 = vrot.slane %v1510_v49, 4  ;;  %v1839_v43 = vpack.c.bf16 %v1523_v38, %v1523_v38 }
 0x433   :  { %v1435_v2 = vpop.permute.xlu0 %1434  ;;  %v1537_v52 = vadd.f32 %v1536_v9, %v1535_v10  ;;  %v1547_v7 = vadd.f32 %v1546_v57, %v1545_v12  ;;  %v1553_v21 = vrot.slane %v1552_v46, 4  ;;  %v1498_v48 = vadd.f32 %v1497_v27, %v1496_v19 }
 0x434   :  { %v1452_v26 = vmul.f32 %v1435_v2, %v5553_v13  ;;  %v1512_v1 = vadd.f32 %v1511_v5, %v1510_v49  ;;  %v1444_v36 = vmul.f32 %v1395_v61, %v5554_v32  ;;  %v1878_v35 = vsel %vm531_vm1, %v1863_v60, %v1862_v0 }
 0x435   :  { %v1864_v50 = vunpack.c.l.b16 %v1832_v4  ;;  %v1840_v62 = vpack.c.bf16 %v1530_v8, %v1530_v8  ;;  %v1488_v40 = vadd.f32 %v1487_v59, %v1486_v28  ;;  %v1865_v37 = vunpack.c.l.b16 %v1833_v22 }
 0x436   :  { %v1569_v51 = vpop.permute.xlu1 %1568  ;;  %v1543_v39 = vrot.slane %v1542_v47, 1  ;;  %v1493_v63 = vadd.f32 %v1492_v25, %v1491_v42  ;;  %v1559_v20 = vsel %vm1453_vm11, %v1452_v26, 0.0  ;;  %v4887_v6 = vunpack.c.l.b16 %v1839_v43 }
 0x437   :  { %v1574_v30 = vpop.permute.xlu0 %1573  ;;  %v1841_v10 = vpack.c.bf16 %v1537_v52, %v1537_v52  ;;  %v1548_v12 = vrot.slane %v1547_v7, 2  ;;  %v1554_v29 = vadd.f32 %v1553_v21, %v1552_v46  ;;  %v1499_v19 = vrot.slane %v1498_v48, 2 }
 0x438   :  { %v1513_v23 = vrot.slane %v1512_v1, 2  ;;  %v1503_v61 = vsel %vm1453_vm11, %v1444_v36, 0.0  ;;  %v1647_v18 = vmul.f32 %v1574_v30, %v5539_v14  ;;  %v1879_v15 = vsel %vm533_vm2, %v1864_v50, %v1878_v35 }
 0x439   :  { %v4892_v28 = vunpack.c.l.b16 %v1840_v62  ;;  %v1834_v60 = vpack.c.bf16 %v1488_v40, %v1488_v40  ;;  %v1560_v42 = vrot.slane %v1559_v20, 4  ;;  %v1880_v9 = vsel %vm535_vm3, %v1865_v37, %v1879_v15 }
 0x43a   :  { %v1579_v38 = vpop.permute.xlu1 %1578  ;;  %v1544_v57 = vadd.f32 %v1543_v39, %v1542_v47  ;;  %v1494_v0 = vrot.slane %v1493_v63, 1  ;;  %v1679_v27 = vrot.slane %v1647_v18, 3  ;;  %v1549_v46 = vadd.f32 %v1548_v12, %v1547_v7 }
 0x43b   :  { %v1614_v2 = vpop.permute.xlu0 %1613  ;;  %v1555_v49 = vrot.slane %v1554_v29, 2  ;;  %v1504_v4 = vrot.slane %v1503_v61, 4  ;;  %v1646_v8 = vmul.f32 %v1569_v51, %v5540_v3  ;;  %v4896_v22 = vunpack.c.l.b16 %v1841_v10 }
 0x43c   :  { %v1500_v14 = vadd.f32 %v1499_v19, %v1498_v48  ;;  %v1514_v59 = vadd.f32 %v1513_v23, %v1512_v1  ;;  %v1717_v30 = vsel %vm1453_vm11, %v1679_v27, 0.0  ;;  %v1866_v25 = vunpack.c.l.b16 %v1834_v60 }
 0x43d   :  { %v1561_v5 = vadd.f32 %v1560_v42, %v1559_v20  ;;  %v1718_v26 = vrot.slane %v1717_v30, 4  ;;  %v1678_v43 = vrot.slane %v1646_v8, 3  ;;  %v1842_v21 = vpack.c.bf16 %v1544_v57, %v1544_v57 }
 0x43e   :  { %v1495_v47 = vadd.f32 %v1494_v0, %v1493_v63  ;;  %v1655_v36 = vmul.f32 %v1614_v2, %v5542_v16  ;;  %v1648_v7 = vmul.f32 %v1579_v38, %v5541_v11  ;;  %v1550_v35 = vrot.slane %v1549_v46, 1  ;;  %v1584_v48 = vpop.permute.xlu1 %1583 }
 0x43f   :  { %v1619_v52 = vpop.permute.xlu0 %1618  ;;  %v1556_v50 = vadd.f32 %v1555_v49, %v1554_v29  ;;  %v1505_v3 = vadd.f32 %v1504_v4, %v1503_v61  ;;  %v1710_v51 = vsel %vm1453_vm11, %v1678_v43, 0.0  ;;  %v1501_v1 = vrot.slane %v1500_v14, 1 }
 0x440   :  { %v1515_v62 = vrot.slane %v1514_v59, 1  ;;  %v1711_v40 = vrot.slane %v1710_v51, 4  ;;  %v1687_v37 = vrot.slane %v1655_v36, 3  ;;  %v1562_v39 = vrot.slane %v1561_v5, 2 }
 0x441   :  { %v1719_v20 = vadd.f32 %v1718_v26, %v1717_v30  ;;  %v1680_v10 = vrot.slane %v1648_v7, 3  ;;  %v1656_v12 = vmul.f32 %v1619_v52, %v5544_v55  ;;  %v4904_v63 = vsel %vm537_vm4, %v1866_v25, %v1880_v9 }
 0x442   :  { %v4906_v16 = vunpack.c.l.b16 %v1842_v21  ;;  %v1712_v11 = vadd.f32 %v1711_v40, %v1710_v51  ;;  %v1773_v29 = vsel %vm1453_vm11, %v1687_v37, 0.0  ;;  %v1835_v2 = vpack.c.bf16 %v1495_v47, %v1495_v47  ;;  %v1589_v27 = vpop.permute.xlu1 %1588 }
 0x443   :  { %v1557_v19 = vrot.slane %v1556_v50, 1  ;;  %v1506_v23 = vrot.slane %v1505_v3, 2  ;;  %v1774_v61 = vrot.slane %v1773_v29, 4  ;;  %v1624_v18 = vpop.permute.xlu0 %1623  ;;  %v1551_v15 = vadd.f32 %v1550_v35, %v1549_v46 }
 0x444   :  { %v1516_v60 = vadd.f32 %v1515_v62, %v1514_v59  ;;  %v1724_v42 = vsel %vm1453_vm11, %v1680_v10, 0.0  ;;  %v1688_v38 = vrot.slane %v1656_v12, 3  ;;  %v1502_v57 = vadd.f32 %v1501_v1, %v1500_v14 }
 0x445   :  { %v1563_v55 = vadd.f32 %v1562_v39, %v1561_v5  ;;  %v1720_v0 = vrot.slane %v1719_v20, 2  ;;  %v1713_v9 = vrot.slane %v1712_v11, 2  ;;  %v1775_v49 = vadd.f32 %v1774_v61, %v1773_v29 }
 0x446   :  { %v1780_v4 = vsel %vm1453_vm11, %v1688_v38, 0.0  ;;  %v1649_v8 = vmul.f32 %v1584_v48, %v5543_v17  ;;  %v1657_v30 = vmul.f32 %v1624_v18, %v5546_v45  ;;  %v1558_v25 = vadd.f32 %v1557_v19, %v1556_v50  ;;  %v1594_v61 = vpop.permute.xlu1 %1593 }
 0x447   :  { %v1507_v26 = vadd.f32 %v1506_v23, %v1505_v3  ;;  %v1725_v43 = vrot.slane %v1724_v42, 4  ;;  %v1781_v46 = vrot.slane %v1780_v4, 4  ;;  %v1838_v59 = vpack.c.bf16 %v1516_v60, %v1516_v60  ;;  %v1629_v62 = vpop.permute.xlu0 %1628 }
 0x448   :  { %v1681_v52 = vrot.slane %v1649_v8, 3  ;;  %v1689_v21 = vrot.slane %v1657_v30, 3  ;;  %v1650_v14 = vmul.f32 %v1589_v27, %v5545_v41  ;;  %v1843_v5 = vpack.c.bf16 %v1551_v15, %v1551_v15 }
 0x449   :  { %v1564_v47 = vrot.slane %v1563_v55, 1  ;;  %v1721_v36 = vadd.f32 %v1720_v0, %v1719_v20  ;;  %v1782_v7 = vadd.f32 %v1781_v46, %v1780_v4  ;;  %v1714_v35 = vadd.f32 %v1713_v9, %v1712_v11 }
 0x44a   :  { %v1776_v51 = vrot.slane %v1775_v49, 2  ;;  %v1731_v1 = vsel %vm1453_vm11, %v1681_v52, 0.0  ;;  %v1682_v17 = vrot.slane %v1650_v14, 3  ;;  %v4915_v48 = vunpack.c.l.b16 %v1835_v2 }
 0x44b   :  { %v1836_v45 = vpack.c.bf16 %v1502_v57, %v1502_v57  ;;  %v1844_v50 = vpack.c.bf16 %v1558_v25, %v1558_v25  ;;  %v1726_v3 = vadd.f32 %v1725_v43, %v1724_v42  ;;  %v1870_v40 = vunpack.c.l.b16 %v1838_v59 }
 0x44c   :  { %v1508_v37 = vrot.slane %v1507_v26, 1  ;;  %v1783_v39 = vrot.slane %v1782_v7, 2  ;;  %v1787_v41 = vsel %vm1453_vm11, %v1689_v21, 0.0  ;;  %v1565_v10 = vadd.f32 %v1564_v47, %v1563_v55  ;;  %v1609_v47 = vpop.permute.xlu1 %1608 }
 0x44d   :  { %v1722_v12 = vrot.slane %v1721_v36, 1  ;;  %v1732_v20 = vrot.slane %v1731_v1, 4  ;;  %v1738_v11 = vsel %vm1453_vm11, %v1682_v17, 0.0  ;;  %v4919_v29 = vunpack.c.l.b16 %v1843_v5 }
 0x44e   :  { %v1715_v19 = vrot.slane %v1714_v35, 1  ;;  %v1777_v23 = vadd.f32 %v1776_v51, %v1775_v49  ;;  %v1658_v2 = vmul.f32 %v1629_v62, %v5547_v33  ;;  %v4922_v18 = vunpack.c.l.b16 %v1836_v45  ;;  %v1634_v49 = vpop.permute.xlu0 %1633 }
 0x44f   :  { %v4924_v15 = vunpack.c.l.b16 %v1844_v50  ;;  %v1727_v60 = vrot.slane %v1726_v3, 2  ;;  %v1788_v42 = vrot.slane %v1787_v41, 4  ;;  %v1885_v38 = vsel %vm531_vm1, %v4887_v6, %v1870_v40 }
 0x450   :  { %v1784_v57 = vadd.f32 %v1783_v39, %v1782_v7  ;;  %v1739_v55 = vrot.slane %v1738_v11, 4  ;;  %v1690_v0 = vrot.slane %v1658_v2, 3  ;;  %v1845_v9 = vpack.c.bf16 %v1565_v10, %v1565_v10 }
 0x451   :  { %v1509_v27 = vadd.f32 %v1508_v37, %v1507_v26  ;;  %v1723_v4 = vadd.f32 %v1722_v12, %v1721_v36  ;;  %v1733_v8 = vadd.f32 %v1732_v20, %v1731_v1  ;;  %v1716_v30 = vadd.f32 %v1715_v19, %v1714_v35 }
 0x452   :  { %v1778_v33 = vrot.slane %v1777_v23, 1  ;;  %v1794_v25 = vsel %vm1453_vm11, %v1690_v0, 0.0  ;;  %v1651_v43 = vmul.f32 %v1594_v61, %v5548_v53  ;;  %v1886_v46 = vsel %vm533_vm2, %v4892_v28, %v1885_v38  ;;  %v1639_v38 = vpop.permute.xlu0 %1638 }
 0x453   :  { %v1728_v59 = vadd.f32 %v1727_v60, %v1726_v3  ;;  %v1789_v52 = vadd.f32 %v1788_v42, %v1787_v41  ;;  %v1795_v6 = vrot.slane %v1794_v25, 4  ;;  %v1785_v21 = vrot.slane %v1784_v57, 1 }
 0x454   :  { %v1740_v14 = vadd.f32 %v1739_v55, %v1738_v11  ;;  %v1683_v5 = vrot.slane %v1651_v43, 3  ;;  %v1659_v26 = vmul.f32 %v1634_v49, %v5549_v56  ;;  %v1837_v36 = vpack.c.bf16 %v1509_v27, %v1509_v27 }
 0x455   :  { %v1951_v7 = vpack.c.bf16 %v1723_v4, %v1723_v4  ;;  %v1734_v35 = vrot.slane %v1733_v8, 2  ;;  %v1796_v51 = vadd.f32 %v1795_v6, %v1794_v25  ;;  %v1950_v1 = vpack.c.bf16 %v1716_v30, %v1716_v30 }
 0x456   :  { %v4933_v17 = vadd.f32 %v1778_v33, %v1777_v23  ;;  %v1745_v53 = vsel %vm1453_vm11, %v1683_v5, 0.0  ;;  %v1691_v45 = vrot.slane %v1659_v26, 3  ;;  %v1729_v28 = vrot.slane %v1728_v59, 1  ;;  %v1644_v26 = vpop.permute.xlu0 %1643 }
 0x457   :  { %v1790_v50 = vrot.slane %v1789_v52, 2  ;;  %v1746_v3 = vrot.slane %v1745_v53, 4  ;;  %v1654_v62 = vmul.f32 %v1609_v47, %v5552_v24  ;;  %v1877_v40 = vunpack.c.l.b16 %v1845_v9 }
 0x458   :  { %v4937_v37 = vadd.f32 %v1785_v21, %v1784_v57  ;;  %v1741_v56 = vrot.slane %v1740_v14, 2  ;;  %v1801_v39 = vsel %vm1453_vm11, %v1691_v45, 0.0  ;;  %v1869_v41 = vunpack.c.l.b16 %v1837_v36  ;;  %v1599_v57 = vpop.permute.xlu1 %1598 }
 0x459   :  { %v4940_v10 = vadd.f32 %v1734_v35, %v1733_v8  ;;  %v1797_v12 = vrot.slane %v1796_v51, 2  ;;  %v1802_v20 = vrot.slane %v1801_v39, 4  ;;  %v4942_v11 = vunpack.c.l.b16 %v1951_v7 }
 0x45a   :  { %v4944_v19 = vunpack.c.l.b16 %v1950_v1  ;;  %v1959_v23 = vpack.c.bf16 %v4933_v17, %v4933_v17  ;;  %v1686_v24 = vrot.slane %v1654_v62, 3  ;;  %v4948_v2 = vadd.f32 %v1729_v28, %v1728_v59 }
 0x45b   :  { %v1791_v61 = vadd.f32 %v1790_v50, %v1789_v52  ;;  %v1747_v60 = vadd.f32 %v1746_v3, %v1745_v53  ;;  %v1803_v42 = vadd.f32 %v1802_v20, %v1801_v39  ;;  %v1960_v55 = vpack.c.bf16 %v4937_v37, %v4937_v37  ;;  %v3900_v39 = vld [vmem:[%s5450_s3 + $0x18] sm:$0xff]  }
 0x45c   :  { %v1742_v0 = vadd.f32 %v1741_v56, %v1740_v14  ;;  %v1766_v9 = vsel %vm1453_vm11, %v1686_v24, 0.0  ;;  %v1887_v27 = vsel %vm535_vm3, %v4896_v22, %v1886_v46  ;;  %v1736_v4 = vrot.slane %v4940_v10, 1  ;;  %v1604_v47 = vpop.permute.xlu1 %1603 }
 0x45d   :  { %v1798_v8 = vadd.f32 %v1797_v12, %v1796_v51  ;;  %v1804_v49 = vrot.slane %v1803_v42, 2  ;;  %v1882_v30 = vsel %vm539_vm5, %v4915_v48, %v4904_v63  ;;  %v1767_v33 = vrot.slane %v1766_v9, 4 }
 0x45e   :  { %v1888_v25 = vsel %vm537_vm4, %v4906_v16, %v1887_v27  ;;  %v1660_v43 = vmul.f32 %v1639_v38, %v5551_v31  ;;  %v1652_v59 = vmul.f32 %v1599_v57, %v5550_v54  ;;  %v1792_v52 = vrot.slane %v1791_v61, 1 }
 0x45f   :  { %v1748_v6 = vrot.slane %v1747_v60, 2  ;;  %v1883_v22 = vsel %vm541_vm6, %v4922_v18, %v1882_v30  ;;  %v1889_v46 = vsel %vm539_vm5, %v4919_v29, %v1888_v25  ;;  %v1768_v21 = vadd.f32 %v1767_v33, %v1766_v9  ;;  %v3899_v18 = vld [vmem:[%s5450_s3 + $0x10] sm:$0xff]  }
 0x460   :  { %v1890_v63 = vsel %vm541_vm6, %v4924_v15, %v1889_v46  ;;  %v1692_v48 = vrot.slane %v1660_v43, 3  ;;  %v1684_v14 = vrot.slane %v1652_v59, 3  ;;  %v1799_v5 = vrot.slane %v1798_v8, 1 }
 0x461   :  { %v1805_v16 = vadd.f32 %v1804_v49, %v1803_v42  ;;  %v1884_v31 = vsel %vm543_vm7, %v1869_v41, %v1883_v22  ;;  %v1891_v54 = vsel %vm543_vm7, %v1877_v40, %v1890_v63  ;;  %v1769_v36 = vrot.slane %v1768_v21, 2 }
 0x462   :  { %v1892_v29 = vpack.c.b16 %v1891_v54, %v1884_v31  ;;  %v1808_v7 = vsel %vm1453_vm11, %v1692_v48, 0.0  ;;  %v1752_v15 = vsel %vm1453_vm11, %v1684_v14, 0.0  ;;  %v1793_v35 = vadd.f32 %v1792_v52, %v1791_v61 }
 0x463   :  { %v1743_v51 = vrot.slane %v1742_v0, 1  ;;  %v1809_v1 = vrot.slane %v1808_v7, 4  ;;  %v1753_v17 = vrot.slane %v1752_v15, 4  ;;  %v1749_v53 = vadd.f32 %v1748_v6, %v1747_v60 }
 0x464   :  { %v1770_v45 = vadd.f32 %v1769_v36, %v1768_v21  ;;  %3850 = vmatmul.mubr.msk.bf16.vlgmr.msra.gmra.mrb[0].mxu1 %vm1905_vm12, %v1892_v29  ;;  %v1661_v28 = vmul.f32 %v1644_v26, %v5553_v13  ;;  %v1653_v50 = vmul.f32 %v1604_v47, %v5554_v32  ;;  %v1991_v3 = vunpack.c.l.b16 %v1959_v23 }
 0x465   :  { %v1800_v62 = vadd.f32 %v1799_v5, %v1798_v8  ;;  %v1810_v40 = vadd.f32 %v1809_v1, %v1808_v7  ;;  %v1754_v56 = vadd.f32 %v1753_v17, %v1752_v15  ;;  %3854 = vmatpush3.bf16.msra.mxu1 %v3899_v18  ;;  %3857 = vmatprep.mubr.msk.bf16.mxu1 %vm4130_vm10, %v4129_v34  ;;  %v1806_v41 = vrot.slane %v1805_v16, 1 }
 0x466   :  { %v1771_v12 = vrot.slane %v1770_v45, 1  ;;  %v1693_v20 = vrot.slane %v1661_v28, 3  ;;  %v1685_v24 = vrot.slane %v1653_v50, 3  ;;  %3855 = vmatprep.subr.bf16.mxu1 %v4129_v34  ;;  %v1737_v13 = vadd.f32 %v1736_v4, %v4940_v10 }
 0x467   :  { %v1744_v32 = vadd.f32 %v1743_v51, %v1742_v0  ;;  %v1811_v23 = vrot.slane %v1810_v40, 2  ;;  %v1755_v61 = vrot.slane %v1754_v56, 2  ;;  %v1750_v60 = vrot.slane %v1749_v53, 1 }
 0x468   :  { %v1772_v42 = vadd.f32 %v1771_v12, %v1770_v45  ;;  %v1815_v38 = vsel %vm1453_vm11, %v1693_v20, 0.0  ;;  %v1759_v57 = vsel %vm1453_vm11, %v1685_v24, 0.0  ;;  %v1961_v30 = vpack.c.bf16 %v1793_v35, %v1793_v35 }
 0x469   :  { %v1812_v9 = vadd.f32 %v1811_v23, %v1810_v40  ;;  %v1756_v27 = vadd.f32 %v1755_v61, %v1754_v56  ;;  %v1816_v8 = vrot.slane %v1815_v38, 4  ;;  %v1760_v49 = vrot.slane %v1759_v57, 4  ;;  %3856 = vmatpush3.bf16.msra.mxu1 %v3900_v39 }
 0x46a   :  { %v1962_v33 = vpack.c.bf16 %v1800_v62, %v1800_v62  ;;  %v1807_v25 = vadd.f32 %v1806_v41, %v1805_v16  ;;  %v1958_v34 = vpack.c.bf16 %v1772_v42, %v1772_v42  ;;  %v1952_v59 = vpack.c.bf16 %v4948_v2, %v4948_v2 }
 0x46b   :  { %v1813_v43 = vrot.slane %v1812_v9, 1  ;;  %v1757_v10 = vrot.slane %v1756_v27, 1  ;;  %v1817_v0 = vadd.f32 %v1816_v8, %v1815_v38  ;;  %v1761_v4 = vadd.f32 %v1760_v49, %v1759_v57  ;;  %v2117_v57 = vld [vmem:[%s5451_s4] sm:$0xff] }
 0x46c   :  { %v1992_v52 = vunpack.c.l.b16 %v1960_v55  ;;  %v1751_v6 = vadd.f32 %v1750_v60, %v1749_v53  ;;  %v1990_v22 = vunpack.c.l.b16 %v1958_v34  ;;  %v1953_v14 = vpack.c.bf16 %v1737_v13, %v1737_v13  ;;  %v2125_v34 = vld [vmem:[%s5451_s4 + $0x40] sm:$0xff] }
 0x46d   :  { %v1814_v46 = vadd.f32 %v1813_v43, %v1812_v9  ;;  %v1758_v21 = vadd.f32 %v1757_v10, %v1756_v27  ;;  %v1818_v63 = vrot.slane %v1817_v0, 2  ;;  %v1762_v48 = vrot.slane %v1761_v4, 2  ;;  %v2121_v9 = vld [vmem:[%s5451_s4 + $0x20] sm:$0xff]  ;;  %v2118_v27 = vld [vmem:[%s5451_s4 + $0x8] sm:$0xff] }
 0x46e   :  { %v1993_v5 = vunpack.c.l.b16 %v1961_v30  ;;  %v1954_v16 = vpack.c.bf16 %v1744_v32, %v1744_v32  ;;  %v2005_v31 = vsel %vm531_vm1, %v1991_v3, %v1990_v22  ;;  %v1994_v54 = vunpack.c.l.b16 %v1962_v33  ;;  %v2122_v30 = vld [vmem:[%s5451_s4 + $0x28] sm:$0xff]  ;;  %v2129_v43 = vld [vmem:[%s5451_s4 + $0x60] sm:$0xff] }
 0x46f   :  { %v1963_v26 = vpack.c.bf16 %v1807_v25, %v1807_v25  ;;  %v2006_v47 = vsel %vm533_vm2, %v1992_v52, %v2005_v31  ;;  %v1819_v2 = vadd.f32 %v1818_v63, %v1817_v0  ;;  %v1955_v18 = vpack.c.bf16 %v1751_v6, %v1751_v6  ;;  %v2126_v10 = vld [vmem:[%s5451_s4 + $0x48] sm:$0xff]  ;;  %v2137_v52 = vld [vmem:[%s5451_s4 + $0xa0] sm:$0xff]  ;;  %v2119_v31 = vld [vmem:[%s5451_s4 + $0x10] sm:$0xff] }
 0x470   :  { %v2007_v37 = vsel %vm535_vm3, %v1993_v5, %v2006_v47  ;;  %v1964_v55 = vpack.c.bf16 %v1814_v46, %v1814_v46  ;;  %v1763_v36 = vadd.f32 %v1762_v48, %v1761_v4  ;;  %v1984_v29 = vunpack.c.l.b16 %v1952_v59  ;;  %v2130_v4 = vld [vmem:[%s5451_s4 + $0x68] sm:$0xff]  ;;  %v2133_v59 = vld [vmem:[%s5451_s4 + $0x80] sm:$0xff] }
 0x471   :  { %v1956_v7 = vpack.c.bf16 %v1758_v21, %v1758_v21  ;;  %v1820_v15 = vrot.slane %v1819_v2, 1  ;;  %v1985_v35 = vunpack.c.l.b16 %v1953_v14  ;;  %v2008_v51 = vsel %vm537_vm4, %v1994_v54, %v2007_v37  ;;  %v2134_v46 = vld [vmem:[%s5451_s4 + $0x88] sm:$0xff]  ;;  %v2141_v14 = vld [vmem:[%s5451_s4 + $0xc0] sm:$0xff]  ;;  %v2123_v54 = vld [vmem:[%s5451_s4 + $0x30] sm:$0xff] }
 0x472   :  { %v1764_v1 = vrot.slane %v1763_v36, 1  ;;  %v1986_v17 = vunpack.c.l.b16 %v1954_v16  ;;  %v1995_v53 = vunpack.c.l.b16 %v1963_v26  ;;  %v1998_v28 = vsel %vm531_vm1, %v4942_v11, %v4944_v19  ;;  %v2138_v21 = vld [vmem:[%s5451_s4 + $0xa8] sm:$0xff]  ;;  %v2145_v5 = vld [vmem:[%s5451_s4 + $0xe0] sm:$0xff]  ;;  %v2120_v26 = vld [vmem:[%s5451_s4 + $0x18] sm:$0xff] }
 0x473   :  { %v1821_v45 = vadd.f32 %v1820_v15, %v1819_v2  ;;  %v1987_v50 = vunpack.c.l.b16 %v1955_v18  ;;  %v1996_v3 = vunpack.c.l.b16 %v1964_v55  ;;  %v1999_v40 = vsel %vm533_vm2, %v1984_v29, %v1998_v28  ;;  %v2142_v47 = vld [vmem:[%s5451_s4 + $0xc8] sm:$0xff]  ;;  %v2124_v37 = vld [vmem:[%s5451_s4 + $0x38] sm:$0xff] }
 0x474   :  { %v1765_v62 = vadd.f32 %v1764_v1, %v1763_v36  ;;  %v2009_v56 = vsel %vm539_vm5, %v1995_v53, %v2008_v51  ;;  %v1988_v39 = vunpack.c.l.b16 %v1956_v7  ;;  %v2000_v12 = vsel %vm535_vm3, %v1985_v35, %v1999_v40  ;;  %v2146_v2 = vld [vmem:[%s5451_s4 + $0xe8] sm:$0xff]  ;;  %v2070_v53 = vpop.permute.xlu1 %2069 }
 0x475   :  { %v1965_v41 = vpack.c.bf16 %v1821_v45, %v1821_v45  ;;  %v2001_v24 = vsel %vm537_vm4, %v1986_v17, %v2000_v12  ;;  %v2010_v23 = vsel %vm541_vm6, %v1996_v3, %v2009_v56  ;;  %v5555_v38 = vmov 0   ;;  %v2072_v3 = vpop.permute.xlu0 %2071  ;;  %v2128_v12 = vld [vmem:[%s5451_s4 + $0x58] sm:$0xff] }
 0x476   :  { %v1957_v20 = vpack.c.bf16 %v1765_v62, %v1765_v62  ;;  %v2002_v32 = vsel %vm539_vm5, %v1987_v50, %v2001_v24  ;;  %v3615_v8 = vcombine.low %v2117_v57, %v2121_v9  ;;  %v3616_v49 = vcombine.high %v2117_v57, %v2121_v9 }
 0x477   :  { %v1997_v13 = vunpack.c.l.b16 %v1965_v41  ;;  %v2003_v19 = vsel %vm541_vm6, %v1988_v39, %v2002_v32  ;;  %v3617_v33 = vcombine.low %v2118_v27, %v2122_v30  ;;  %v3618_v25 = vcombine.high %v2118_v27, %v2122_v30  ;;  %v2127_v39 = vld [vmem:[%s5451_s4 + $0x50] sm:$0xff] }
 0x478   :  { %v1989_v11 = vunpack.c.l.b16 %v1957_v20  ;;  %2346 = vmatprep.subr.bf16.mxu1 %v3616_v49  ;;  %v3624_v0 = vcombine.high %v2125_v34, %v2129_v43  ;;  %v3623_v6 = vcombine.low %v2125_v34, %v2129_v43  ;;  %v3626_v22 = vcombine.high %v2126_v10, %v2130_v4  ;;  %v2131_v41 = vld [vmem:[%s5451_s4 + $0x70] sm:$0xff]  ;;  %v2132_v20 = vld [vmem:[%s5451_s4 + $0x78] sm:$0xff]  ;;  %v2082_v9 = vpop.permute.xlu1 %2081 }
 0x479   :  { %v2011_v61 = vsel %vm543_vm7, %v1997_v13, %v2010_v23  ;;  %2389 = vmatprep.subr.bf16.mxu0 %v3618_v25  ;;  %v3625_v63 = vcombine.low %v2126_v10, %v2130_v4  ;;  %v3632_v48 = vcombine.high %v2133_v59, %v2137_v52  ;;  %v3634_v16 = vcombine.high %v2134_v46, %v2138_v21  ;;  %v2084_v57 = vpop.permute.xlu0 %2083  ;;  %v2147_v25 = vld [vmem:[%s5451_s4 + $0xf0] sm:$0xff]  ;;  %v2144_v34 = vld [vmem:[%s5451_s4 + $0xd8] sm:$0xff] }
 0x47a   :  { %v2004_v60 = vsel %vm543_vm7, %v1989_v11, %v2003_v19  ;;  %2390 = vmatpush1.bf16.msra.mxu0 %v3617_v33  ;;  %v3619_v18 = vcombine.low %v2119_v31, %v2123_v54  ;;  %v3631_v55 = vcombine.low %v2133_v59, %v2137_v52  ;;  %v3621_v36 = vcombine.low %v2120_v26, %v2124_v37  ;;  %v2135_v19 = vld [vmem:[%s5451_s4 + $0x90] sm:$0xff]  ;;  %v2148_v43 = vld [vmem:[%s5451_s4 + $0xf8] sm:$0xff] }
 0x47b   :  { %v2012_v42 = vpack.c.b16 %v2011_v61, %v2004_v60  ;;  %2391 = vmatprep.subr.bf16.mxu0 %v3626_v22  ;;  %v3633_v29 = vcombine.low %v2134_v46, %v2138_v21  ;;  %v3640_v7 = vcombine.high %v2141_v14, %v2145_v5  ;;  %v3642_v15 = vcombine.high %v2142_v47, %v2146_v2  ;;  %v2139_v61 = vld [vmem:[%s5451_s4 + $0xb0] sm:$0xff]  ;;  %v2136_v60 = vld [vmem:[%s5451_s4 + $0x98] sm:$0xff]  ;;  %v2149_v22 = vld [vmem:[%s5451_s4 + $0x100] sm:$0xff] }
 0x47c   :  { %v3639_v35 = vcombine.low %v2141_v14, %v2145_v5  ;;  %v3641_v51 = vcombine.low %v2142_v47, %v2146_v2  ;;  %v3620_v1 = vcombine.high %v2119_v31, %v2123_v54  ;;  %v3622_v17 = vcombine.high %v2120_v26, %v2124_v37  ;;  %v2143_v33 = vld [vmem:[%s5451_s4 + $0xd0] sm:$0xff]  ;;  %v2086_v4 = vpop.permute.xlu1 %2085  ;;  %v2154_v14 = vld [vmem:[%s5451_s4 + $0x128] sm:$0xff] }
 0x47d   :  { %3858 = vmatmul.mubr.msk.bf16.vlgmr.msra.gmra.mrb[4].mxu1 %vm1905_vm12, %v2012_v42  ;;  %v3628_v23 = vcombine.high %v2127_v39, %v2131_v41  ;;  %v3630_v11 = vcombine.high %v2128_v12, %v2132_v20  ;;  %v2140_v42 = vld [vmem:[%s5451_s4 + $0xb8] sm:$0xff]  ;;  %v3627_v27 = vcombine.low %v2127_v39, %v2131_v41  ;;  %v3636_v49 = vcombine.high %v2135_v19, %v2139_v61  ;;  %v2088_v59 = vpop.permute.xlu0 %2087  ;;  %v2173_v39 = vld [vmem:[%s5451_s4 + $0x1c0] sm:$0xff] }
 0x47e   :  { %2378 = vmatprep.mubr.bf16.mxu1 %v5555_v38  ;;  %2347 = vmatpush1.bf16.msra.mxu1 %v3615_v8  ;;  %v3629_v8 = vcombine.low %v2128_v12, %v2132_v20  ;;  %v3638_v30 = vcombine.high %v2136_v60, %v2140_v42  ;;  %v3635_v10 = vcombine.low %v2135_v19, %v2139_v61  ;;  %v2177_v41 = vld [vmem:[%s5451_s4 + $0x1e0] sm:$0xff]  ;;  %v2174_v12 = vld [vmem:[%s5451_s4 + $0x1c8] sm:$0xff]  ;;  %v2151_v61 = vld [vmem:[%s5451_s4 + $0x110] sm:$0xff] }
 0x47f   :  { %2348 = vmatprep.subr.bf16.mxu1 %v3624_v0  ;;  %2392 = vmatpush1.bf16.msra.mxu0 %v3625_v63  ;;  %v3637_v0 = vcombine.low %v2136_v60, %v2140_v42  ;;  %v3644_v52 = vcombine.high %v2143_v33, %v2147_v25  ;;  %v2089_v46 = vsel %vm1905_vm12, %v2082_v9, %v2084_v57  ;;  %v2153_v63 = vld [vmem:[%s5451_s4 + $0x120] sm:$0xff]  ;;  %v2178_v20 = vld [vmem:[%s5451_s4 + $0x1e8] sm:$0xff]  ;;  %v2155_v60 = vld [vmem:[%s5451_s4 + $0x130] sm:$0xff] }
 0x480   :  { %2393 = vmatprep.subr.bf16.mxu0 %v3634_v16  ;;  %v2090_v31 = vsel %vm1905_vm12, %v2086_v4, %v2088_v59  ;;  %v3643_v54 = vcombine.low %v2143_v33, %v2147_v25  ;;  %v3645_v26 = vcombine.low %v2144_v34, %v2148_v43  ;;  %v3652_v2 = vcombine.high %v2149_v22, %v2153_v63  ;;  %v2152_v42 = vld [vmem:[%s5451_s4 + $0x118] sm:$0xff]  ;;  %v2159_v33 = vld [vmem:[%s5451_s4 + $0x150] sm:$0xff] }
 0x481   :  { %v3678_v19 = vcombine.high %v2174_v12, %v2178_v20  ;;  %v2156_v57 = vld [vmem:[%s5451_s4 + $0x138] sm:$0xff]  ;;  %v2163_v25 = vld [vmem:[%s5451_s4 + $0x170] sm:$0xff] }
 0x482   :  { %2349 = vmatpush1.bf16.msra.mxu1 %v3623_v6  ;;  %v3646_v6 = vcombine.high %v2144_v34, %v2148_v43  ;;  %v2160_v34 = vld [vmem:[%s5451_s4 + $0x158] sm:$0xff]  ;;  %v3664_v4 = vcombine.high %v2159_v33, %v2163_v25 }
 0x483   :  { %2350 = vmatprep.subr.bf16.mxu1 %v3632_v48  ;;  %2394 = vmatpush1.bf16.msra.mxu0 %v3633_v29  ;;  %v2150_v48 = vld [vmem:[%s5451_s4 + $0x108] sm:$0xff]  ;;  %v2161_v29 = vld [vmem:[%s5451_s4 + $0x160] sm:$0xff]  ;;  %v2164_v43 = vld [vmem:[%s5451_s4 + $0x178] sm:$0xff] }
 0x484   :  { %2395 = vmatprep.subr.bf16.mxu0 %v3642_v15  ;;  %v2162_v15 = vld [vmem:[%s5451_s4 + $0x168] sm:$0xff]  ;;  %v3666_v59 = vcombine.high %v2160_v34, %v2164_v43 }
 0x486   :  { %2351 = vmatpush1.bf16.msra.mxu1 %v3631_v55 }
 0x487   :  { %2352 = vmatprep.subr.bf16.mxu1 %v3640_v7  ;;  %2396 = vmatpush1.bf16.msra.mxu0 %v3641_v51  ;;  %v2158_v7 = vld [vmem:[%s5451_s4 + $0x148] sm:$0xff]  ;;  %v3653_v51 = vcombine.low %v2150_v48, %v2154_v14 }
 0x488   :  { %2475 = vmatprep.subr.bf16.mxu0 %v3622_v17  ;;  %v3662_v17 = vcombine.high %v2158_v7, %v2162_v15 }
 0x48a   :  { %2353 = vmatpush1.bf16.msra.mxu1 %v3639_v35  ;;  %v3651_v35 = vcombine.low %v2149_v22, %v2153_v63  ;;  %v2168_v22 = vld [vmem:[%s5451_s4 + $0x198] sm:$0xff]  ;;  %v3665_v63 = vcombine.low %v2160_v34, %v2164_v43 }
 0x48b   :  { %2432 = vmatprep.subr.bf16.mxu1 %v3620_v1 }
 0x537   :  { %v1943_v45 = vpop.f32.mrb[0].mxu1 }
 0x538   :  { %v2075_v28 = vadd.f32 %v2070_v53, %v1943_v45  ;;  %2099 = vrot.lane.b32.xlu1 %v1943_v45, %s4127_s1  ;;  %v3851_v50 = vpop.f32.mrb[1].mxu1  ;;  %v2165_v53 = vld [vmem:[%s5451_s4 + $0x180] sm:$0xff] }
 0x539   :  { %v1946_v62 = vpop.f32.mrb[2].mxu1  ;;  %v2169_v45 = vld [vmem:[%s5451_s4 + $0x1a0] sm:$0xff]  ;;  %v2170_v50 = vld [vmem:[%s5451_s4 + $0x1a8] sm:$0xff] }
 0x53a   :  { %v2076_v40 = vadd.f32 %v2072_v3, %v1946_v62  ;;  %v3852_v56 = vpop.f32.mrb[3].mxu1  ;;  %2101 = vrot.lane.b32.xlu0 %v1946_v62, %s4127_s1  ;;  %4093 = vtanh.f32 %v2075_v28  ;;  %v2166_v28 = vld [vmem:[%s5451_s4 + $0x188] sm:$0xff]  ;;  %v3661_v62 = vcombine.low %v2158_v7, %v2162_v15  ;;  %v3904_v7 = vld [vmem:[%s5452_s5 + $0x80] sm:$0xff]  }
 0x53b   :  { %v3670_v56 = vcombine.high %v2166_v28, %v2170_v50  ;;  %v3905_v15 = vld [vmem:[%s5452_s5 + $0x48] sm:$0xff]  }
 0x53c   :  { %4095 = vtanh.f32 %v2076_v40  ;;  %v3668_v40 = vcombine.high %v2165_v53, %v2169_v45 }
 0x544   :  { %v4094_v24 = vpop.eup %4093 }
 0x546   :  { %v4096_v13 = vpop.eup %4095 }
 0x547   :  { %v5085_v32 = vpack.c.bf16 %v4096_v13, %v4094_v24  ;;  %v3667_v13 = vcombine.low %v2165_v53, %v2169_v45  ;;  %v3910_v53 = vld [vmem:[%s5452_s5 + $0xd0] sm:$0xff]  }
 0x548   :  { %v3911_v45 = vld [vmem:[%s5452_s5 + $0x10] sm:$0xff]  }
 0x549   :  { %3647 = vmatmul.mubr.msk.bf16.vlgmr.msra.gmra.mrb[8].mxu1 %vm2342_vm13, %v5085_v32  ;;  %3648 = vmatmul.mubr.msk.bf16.vlgmr.msra.gmra.mrb[4].mxu0 %vm2342_vm13, %v5085_v32 }
 0x54a   :  { %2433 = vmatpush1.bf16.msra.mxu1 %v3619_v18  ;;  %2476 = vmatpush1.bf16.msra.mxu0 %v3621_v36  ;;  %v3654_v18 = vcombine.high %v2150_v48, %v2154_v14  ;;  %v2157_v36 = vld [vmem:[%s5451_s4 + $0x140] sm:$0xff] }
 0x54b   :  { %2434 = vmatprep.subr.bf16.mxu1 %v3628_v23  ;;  %2477 = vmatprep.subr.bf16.mxu0 %v3630_v11  ;;  %v3660_v1 = vcombine.high %v2157_v36, %v2161_v29  ;;  %v3659_v3 = vcombine.low %v2157_v36, %v2161_v29  ;;  %v3676_v11 = vcombine.high %v2173_v39, %v2177_v41  ;;  %v3902_v36 = vld [vmem:[%s5452_s5 + $0xc0] sm:$0xff]  }
 0x54c   :  { %2464 = vmatprep.mubr.bf16.mxu1 %v5555_v38  ;;  %2507 = vmatprep.mubr.bf16.mxu0 %v5555_v38  ;;  %v3903_v29 = vld [vmem:[%s5452_s5] sm:$0xff]  }
 0x54e   :  { %2435 = vmatpush1.bf16.msra.mxu1 %v3627_v27  ;;  %2478 = vmatpush1.bf16.msra.mxu0 %v3629_v8  ;;  %v3675_v27 = vcombine.low %v2173_v39, %v2177_v41  ;;  %v3677_v8 = vcombine.low %v2174_v12, %v2178_v20  ;;  %v3918_v39 = vld [vmem:[%s5452_s5 + $0xe0] sm:$0xff]   ;;  %v3921_v20 = vld [vmem:[%s5452_s5 + $0x68] sm:$0xff]  }
 0x54f   :  { %2436 = vmatprep.subr.bf16.mxu1 %v3636_v49  ;;  %2479 = vmatprep.subr.bf16.mxu0 %v3638_v30  ;;  %v3656_v49 = vcombine.high %v2151_v61, %v2155_v60  ;;  %v3658_v30 = vcombine.high %v2152_v42, %v2156_v57  ;;  %v3919_v41 = vld [vmem:[%s5452_s5 + $0x20] sm:$0xff]  }
 0x550   :  { %v2062_v21 = vpop.f32.mrb[4].mxu1  ;;  %v3920_v12 = vld [vmem:[%s5452_s5 + $0xa0] sm:$0xff]  }
 0x551   :  { %v2093_v5 = vadd.f32 %v2089_v46, %v2062_v21  ;;  %2109 = vrot.lane.b32.xlu1 %v2062_v21, %s4127_s1  ;;  %v3859_v16 = vpop.f32.mrb[5].mxu1  ;;  %v2172_v46 = vld [vmem:[%s5451_s4 + $0x1b8] sm:$0xff]  ;;  %v3663_v21 = vcombine.low %v2159_v33, %v2163_v25 }
 0x552   :  { %2437 = vmatpush1.bf16.msra.mxu1 %v3635_v10  ;;  %2480 = vmatpush1.bf16.msra.mxu0 %v3637_v0  ;;  %v2065_v47 = vpop.f32.mrb[6].mxu1  ;;  %v3655_v10 = vcombine.low %v2151_v61, %v2155_v60  ;;  %v3657_v0 = vcombine.low %v2152_v42, %v2156_v57  ;;  %v3674_v14 = vcombine.high %v2168_v22, %v2172_v46  ;;  %v2179_v16 = vld [vmem:[%s5451_s4 + $0x1f0] sm:$0xff]  ;;  %v3929_v60 = vld [vmem:[%s5452_s5 + $0x78] sm:$0xff]  }
 0x553   :  { %2438 = vmatprep.subr.bf16.mxu1 %v3644_v52  ;;  %2481 = vmatprep.subr.bf16.mxu0 %v3646_v6  ;;  %v2094_v37 = vadd.f32 %v2090_v31, %v2065_v47  ;;  %v3860_v55 = vpop.f32.mrb[7].mxu1  ;;  %4097 = vtanh.f32 %v2093_v5  ;;  %v2167_v52 = vld [vmem:[%s5451_s4 + $0x190] sm:$0xff]  ;;  %v2176_v31 = vld [vmem:[%s5451_s4 + $0x1d8] sm:$0xff] }
 0x554   :  { %2111 = vrot.lane.b32.xlu0 %v2065_v47, %s4127_s1  ;;  %v2171_v6 = vld [vmem:[%s5451_s4 + $0x1b0] sm:$0xff]  ;;  %v3673_v47 = vcombine.low %v2168_v22, %v2172_v46  ;;  %v3930_v42 = vld [vmem:[%s5452_s5 + $0xf8] sm:$0xff]  }
 0x555   :  { %4099 = vtanh.f32 %v2094_v37  ;;  %v3672_v48 = vcombine.high %v2167_v52, %v2171_v6  ;;  %v2175_v5 = vld [vmem:[%s5451_s4 + $0x1d0] sm:$0xff]  ;;  %v3931_v57 = vld [vmem:[%s5452_s5 + $0x38] sm:$0xff]  }
 0x556   :  { %2439 = vmatpush1.bf16.msra.mxu1 %v3643_v54  ;;  %2482 = vmatpush1.bf16.msra.mxu0 %v3645_v26  ;;  %v2180_v54 = vld [vmem:[%s5451_s4 + $0x1f8] sm:$0xff]  ;;  %v3671_v26 = vcombine.low %v2167_v52, %v2171_v6  ;;  %v3679_v37 = vcombine.low %v2175_v5, %v2179_v16  ;;  %v3928_v61 = vld [vmem:[%s5452_s5 + $0xb0] sm:$0xff]  }
 0x557   :  { %2682 = vmatprep.subr.bf16.mxu1 %v3652_v2  ;;  %2725 = vmatprep.subr.bf16.mxu0 %v3654_v18  ;;  %v3680_v2 = vcombine.high %v2175_v5, %v2179_v16  ;;  %v3682_v18 = vcombine.high %v2176_v31, %v2180_v54  ;;  %v3681_v55 = vcombine.low %v2176_v31, %v2180_v54 }
 0x559   :  { %3649 = vmatmul.mubr.msk.bf16.vlgmr.msra.gmra.mrb[12].mxu1 %vm2342_vm13, %v5085_v32  ;;  %3650 = vmatmul.mubr.msk.bf16.vlgmr.msra.gmra.mrb[8].mxu0 %vm2342_vm13, %v5085_v32  ;;  %v3669_v32 = vcombine.low %v2166_v28, %v2170_v50  ;;  %v3912_v28 = vld [vmem:[%s5452_s5 + $0x90] sm:$0xff]   ;;  %v3913_v50 = vld [vmem:[%s5452_s5 + $0x58] sm:$0xff]  }
 0x55a   :  { %2683 = vmatpush1.bf16.msra.mxu1 %v3651_v35  ;;  %2726 = vmatpush1.bf16.msra.mxu0 %v3653_v51  ;;  %v3906_v35 = vld [vmem:[%s5452_s5 + $0xc8] sm:$0xff]  }
 0x55b   :  { %2684 = vmatprep.subr.bf16.mxu1 %v3660_v1  ;;  %2727 = vmatprep.subr.bf16.mxu0 %v3662_v17  ;;  %v3907_v51 = vld [vmem:[%s5452_s5 + $0x8] sm:$0xff]   ;;  %v3909_v17 = vld [vmem:[%s5452_s5 + $0x50] sm:$0xff]  }
 0x55c   :  { %2714 = vmatprep.mubr.bf16.mxu1 %v5555_v38  ;;  %2757 = vmatprep.mubr.bf16.mxu0 %v5555_v38  ;;  %v3908_v1 = vld [vmem:[%s5452_s5 + $0x88] sm:$0xff]  }
 0x55d   :  { %v4098_v24 = vpop.eup %4097 }
 0x55e   :  { %2685 = vmatpush1.bf16.msra.mxu1 %v3659_v3  ;;  %2728 = vmatpush1.bf16.msra.mxu0 %v3661_v62  ;;  %v3914_v3 = vld [vmem:[%s5452_s5 + $0xd8] sm:$0xff]  }
 0x55f   :  { %v4100_v23 = vpop.eup %4099  ;;  %2686 = vmatprep.subr.bf16.mxu1 %v3668_v40  ;;  %2729 = vmatprep.subr.bf16.mxu0 %v3670_v56  ;;  %v3915_v62 = vld [vmem:[%s5452_s5 + $0x18] sm:$0xff]   ;;  %v3917_v56 = vld [vmem:[%s5452_s5 + $0x60] sm:$0xff]  }
 0x560   :  { %v2518_v9 = vpack.c.bf16 %v4100_v23, %v4098_v24  ;;  %v3916_v40 = vld [vmem:[%s5452_s5 + $0x98] sm:$0xff]   ;;  %v3922_v24 = vld [vmem:[%s5452_s5 + $0xe8] sm:$0xff]   ;;  %v3925_v23 = vld [vmem:[%s5452_s5 + $0x70] sm:$0xff]  }
 0x562   :  { %2687 = vmatpush1.bf16.msra.mxu1 %v3667_v13  ;;  %2730 = vmatpush1.bf16.msra.mxu0 %v3669_v32  ;;  %v3923_v13 = vld [vmem:[%s5452_s5 + $0x28] sm:$0xff]  }
 0x563   :  { %2688 = vmatprep.subr.bf16.mxu1 %v3676_v11  ;;  %2731 = vmatprep.subr.bf16.mxu0 %v3678_v19  ;;  %v3924_v32 = vld [vmem:[%s5452_s5 + $0xa8] sm:$0xff]   ;;  %v3926_v11 = vld [vmem:[%s5452_s5 + $0xf0] sm:$0xff]  }
 0x564   :  { %v3927_v19 = vld [vmem:[%s5452_s5 + $0x30] sm:$0xff]  }
 0x566   :  { %2689 = vmatpush1.bf16.msra.mxu1 %v3675_v27  ;;  %2732 = vmatpush1.bf16.msra.mxu0 %v3677_v8  ;;  %v3933_v27 = vld [vmem:[%s5452_s5 + $0x140] sm:$0xff]  }
 0x567   :  { %2768 = vmatprep.subr.bf16.mxu1 %v3656_v49  ;;  %2811 = vmatprep.subr.bf16.mxu0 %v3658_v30  ;;  %v3934_v8 = vld [vmem:[%s5452_s5 + $0x1c0] sm:$0xff]  }
 0x569   :  { %3683 = vmatmul.mubr.msk.bf16.vlgmr.msra.gmra.mrb[16].mxu1 %vm2342_vm13, %v2518_v9  ;;  %3684 = vmatmul.mubr.msk.bf16.vlgmr.msra.gmra.mrb[12].mxu0 %vm2342_vm13, %v2518_v9 }
 0x56a   :  { %2769 = vmatpush1.bf16.msra.mxu1 %v3655_v10  ;;  %2812 = vmatpush1.bf16.msra.mxu0 %v3657_v0 }
 0x56b   :  { %2770 = vmatprep.subr.bf16.mxu1 %v3664_v4  ;;  %2813 = vmatprep.subr.bf16.mxu0 %v3666_v59 }
 0x56c   :  { %2800 = vmatprep.mubr.bf16.mxu1 %v5555_v38  ;;  %2843 = vmatprep.mubr.bf16.mxu0 %v5555_v38  ;;  %v3901_v38 = vld [vmem:[%s5452_s5 + $0x40] sm:$0xff]  }
 0x56e   :  { %2771 = vmatpush1.bf16.msra.mxu1 %v3663_v21  ;;  %2814 = vmatpush1.bf16.msra.mxu0 %v3665_v63 }
 0x56f   :  { %2772 = vmatprep.subr.bf16.mxu1 %v3672_v48  ;;  %2815 = vmatprep.subr.bf16.mxu0 %v3674_v14 }
 0x572   :  { %2773 = vmatpush1.bf16.msra.mxu1 %v3671_v26  ;;  %2816 = vmatpush1.bf16.msra.mxu0 %v3673_v47 }
 0x573   :  { %2774 = vmatprep.subr.bf16.mxu1 %v3680_v2  ;;  %2817 = vmatprep.subr.bf16.mxu0 %v3682_v18 }
 0x576   :  { %2775 = vmatpush1.bf16.msra.mxu1 %v3679_v37  ;;  %2818 = vmatpush1.bf16.msra.mxu0 %v3681_v55 }
 0x577   :  { %3757 = vmatprep.subr.bf16.mxu1 %v3901_v38  ;;  %3779 = vmatprep.subr.bf16.mxu0 %v3902_v36 }
 0x579   :  { %3685 = vmatmul.mubr.msk.bf16.vlgmr.msra.gmra.mrb[20].mxu1 %vm2342_vm13, %v2518_v9  ;;  %3686 = vmatmul.mubr.msk.bf16.vlgmr.msra.gmra.mrb[16].mxu0 %vm2342_vm13, %v2518_v9  ;;  %v3932_v9 = vld [vmem:[%s5452_s5 + $0xb8] sm:$0xff]  }
 0x57a   :  { %3758 = vmatpush3.bf16.msra.mxu1 %v3903_v29  ;;  %3780 = vmatpush3.bf16.msra.mxu0 %v3904_v7 }
 0x57b   :  { %3759 = vmatprep.subr.bf16.mxu1 %v3905_v15  ;;  %3781 = vmatprep.subr.bf16.mxu0 %v3906_v35 }
 0x57e   :  { %3760 = vmatpush3.bf16.msra.mxu1 %v3907_v51  ;;  %3782 = vmatpush3.bf16.msra.mxu0 %v3908_v1 }
 0x57f   :  { %3761 = vmatprep.subr.bf16.mxu1 %v3909_v17  ;;  %3783 = vmatprep.subr.bf16.mxu0 %v3910_v53  ;;  %v3935_v17 = vld [vmem:[%s5452_s5 + $0x100] sm:$0xff]  }
 0x580   :  { %v3936_v53 = vld [vmem:[%s5452_s5 + $0x180] sm:$0xff]  }
 0x582   :  { %3762 = vmatpush3.bf16.msra.mxu1 %v3911_v45  ;;  %3784 = vmatpush3.bf16.msra.mxu0 %v3912_v28  ;;  %v3937_v45 = vld [vmem:[%s5452_s5 + $0x148] sm:$0xff]  }
 0x583   :  { %3763 = vmatprep.subr.bf16.mxu1 %v3913_v50  ;;  %3785 = vmatprep.subr.bf16.mxu0 %v3914_v3  ;;  %v3938_v28 = vld [vmem:[%s5452_s5 + $0x1c8] sm:$0xff]  }
 0x584   :  { %v3939_v50 = vld [vmem:[%s5452_s5 + $0x108] sm:$0xff]  }
 0x585   :  { %v3940_v3 = vld [vmem:[%s5452_s5 + $0x188] sm:$0xff]  }
 0x586   :  { %3764 = vmatpush3.bf16.msra.mxu1 %v3915_v62  ;;  %3786 = vmatpush3.bf16.msra.mxu0 %v3916_v40  ;;  %v3941_v62 = vld [vmem:[%s5452_s5 + $0x150] sm:$0xff]  }
 0x587   :  { %3765 = vmatprep.subr.bf16.mxu1 %v3917_v56  ;;  %3787 = vmatprep.subr.bf16.mxu0 %v3918_v39  ;;  %v3942_v40 = vld [vmem:[%s5452_s5 + $0x1d0] sm:$0xff]  }
 0x588   :  { %v3943_v56 = vld [vmem:[%s5452_s5 + $0x110] sm:$0xff]  }
 0x589   :  { %v3944_v39 = vld [vmem:[%s5452_s5 + $0x190] sm:$0xff]  }
 0x58a   :  { %3766 = vmatpush3.bf16.msra.mxu1 %v3919_v41  ;;  %3788 = vmatpush3.bf16.msra.mxu0 %v3920_v12  ;;  %v3945_v41 = vld [vmem:[%s5452_s5 + $0x158] sm:$0xff]  }
 0x58b   :  { %3767 = vmatprep.subr.bf16.mxu1 %v3921_v20  ;;  %3789 = vmatprep.subr.bf16.mxu0 %v3922_v24  ;;  %v3946_v12 = vld [vmem:[%s5452_s5 + $0x1d8] sm:$0xff]  }
 0x58e   :  { %3768 = vmatpush3.bf16.msra.mxu1 %v3923_v13  ;;  %3790 = vmatpush3.bf16.msra.mxu0 %v3924_v32 }
 0x58f   :  { %3769 = vmatprep.subr.bf16.mxu1 %v3925_v23  ;;  %3791 = vmatprep.subr.bf16.mxu0 %v3926_v11 }
 0x592   :  { %3770 = vmatpush3.bf16.msra.mxu1 %v3927_v19  ;;  %3792 = vmatpush3.bf16.msra.mxu0 %v3928_v61 }
 0x593   :  { %3771 = vmatprep.subr.bf16.mxu1 %v3929_v60  ;;  %3793 = vmatprep.subr.bf16.mxu0 %v3930_v42 }
 0x596   :  { %3772 = vmatpush3.bf16.msra.mxu1 %v3931_v57  ;;  %3794 = vmatpush3.bf16.msra.mxu0 %v3932_v9  ;;  %v3947_v57 = vld [vmem:[%s5452_s5 + $0x118] sm:$0xff]  }
 0x597   :  { %3801 = vmatprep.subr.bf16.mxu1 %v3933_v27  ;;  %3823 = vmatprep.subr.bf16.mxu0 %v3934_v8  ;;  %v3948_v9 = vld [vmem:[%s5452_s5 + $0x198] sm:$0xff]  }
 0x61c   :  { %v2380_v49 = vpop.f32.mrb[8].mxu1  ;;  %v2423_v30 = vpop.f32.mrb[4].mxu0 }
 0x61d   :  { %v2382_v33 = vpop.f32.mrb[9].mxu1  ;;  %v2425_v25 = vpop.f32.mrb[5].mxu0 }
 0x61e   :  { %v2384_v34 = vpop.f32.mrb[10].mxu1  ;;  %v2427_v43 = vpop.f32.mrb[6].mxu0 }
 0x61f   :  { %v2386_v10 = vpop.f32.mrb[11].mxu1  ;;  %v2429_v0 = vpop.f32.mrb[7].mxu0 }
 0x62c   :  { %v2466_v4 = vpop.f32.mrb[12].mxu1  ;;  %v2509_v59 = vpop.f32.mrb[8].mxu0 }
 0x62d   :  { %v2468_v52 = vpop.f32.mrb[13].mxu1  ;;  %v2511_v6 = vpop.f32.mrb[9].mxu0 }
 0x62e   :  { %v2470_v22 = vpop.f32.mrb[14].mxu1  ;;  %v2513_v46 = vpop.f32.mrb[10].mxu0 }
 0x62f   :  { %v5331_v21 = vpop.f32.mrb[15].mxu1  ;;  %v5333_v63 = vpop.f32.mrb[11].mxu0 }
 0x63c   :  { %v2716_v48 = vpop.f32.mrb[16].mxu1  ;;  %v2759_v14 = vpop.f32.mrb[12].mxu0 }
 0x63d   :  { %v2854_v5 = vmul.f32 %v2716_v48, %v2380_v49  ;;  %v2856_v16 = vmul.f32 %v2759_v14, %v2423_v30  ;;  %v2718_v31 = vpop.f32.mrb[17].mxu1  ;;  %v2761_v54 = vpop.f32.mrb[13].mxu0  ;;  %v3957_v48 = vld [vmem:[%s5452_s5 + $0x170] sm:$0xff]  }
 0x63e   :  { %v2855_v26 = vmul.f32 %v2718_v31, %v2382_v33  ;;  %v2857_v47 = vmul.f32 %v2761_v54, %v2425_v25  ;;  %v2720_v2 = vpop.f32.mrb[18].mxu1  ;;  %v2763_v18 = vpop.f32.mrb[14].mxu0  ;;  %v3949_v33 = vld [vmem:[%s5452_s5 + $0x160] sm:$0xff]   ;;  %v3958_v14 = vld [vmem:[%s5452_s5 + $0x1f0] sm:$0xff]   ;;  %v3961_v31 = vld [vmem:[%s5452_s5 + $0x178] sm:$0xff]  }
 0x63f   :  { %v2862_v37 = vmul.f32 %v2720_v2, %v2384_v34  ;;  %v2864_v55 = vmul.f32 %v2763_v18, %v2427_v43  ;;  %v2722_v38 = vpop.f32.mrb[19].mxu1  ;;  %v2765_v36 = vpop.f32.mrb[15].mxu0  ;;  %v3950_v25 = vld [vmem:[%s5452_s5 + $0x1e0] sm:$0xff]   ;;  %v3962_v54 = vld [vmem:[%s5452_s5 + $0x1f8] sm:$0xff]  }
 0x640   :  { %v2863_v29 = vmul.f32 %v2722_v38, %v2386_v10  ;;  %v2865_v7 = vmul.f32 %v2765_v36, %v2429_v0 }
 0x641   :  { %v2870_v15 = vpack.c.bf16 %v2862_v37, %v2854_v5  ;;  %v2872_v35 = vpack.c.bf16 %v2864_v55, %v2856_v16  ;;  %v3959_v5 = vld [vmem:[%s5452_s5 + $0x130] sm:$0xff]  }
 0x642   :  { %v2871_v51 = vpack.c.bf16 %v2863_v29, %v2855_v26  ;;  %v2873_v1 = vpack.c.bf16 %v2865_v7, %v2857_v47  ;;  %v3960_v16 = vld [vmem:[%s5452_s5 + $0x1b0] sm:$0xff]   ;;  %v3963_v26 = vld [vmem:[%s5452_s5 + $0x138] sm:$0xff]  }
 0x643   :  { %v3964_v47 = vld [vmem:[%s5452_s5 + $0x1b8] sm:$0xff]  }
 0x644   :  { %3422 = vmatprep.mubr.bf16.mxu1 %v2871_v51  ;;  %3463 = vmatprep.mubr.bf16.mxu0 %v2873_v1 }
 0x645   :  { %3423 = vmatmul.mubr.bf16.vlgmr.msra.gmra.mrb[24].mxu1 %v2870_v15  ;;  %3464 = vmatmul.mubr.bf16.vlgmr.msra.gmra.mrb[20].mxu0 %v2872_v35 }
 0x646   :  { %3802 = vmatpush3.bf16.msra.mxu1 %v3935_v17  ;;  %3824 = vmatpush3.bf16.msra.mxu0 %v3936_v53 }
 0x647   :  { %3803 = vmatprep.subr.bf16.mxu1 %v3937_v45  ;;  %3825 = vmatprep.subr.bf16.mxu0 %v3938_v28 }
 0x64a   :  { %3804 = vmatpush3.bf16.msra.mxu1 %v3939_v50  ;;  %3826 = vmatpush3.bf16.msra.mxu0 %v3940_v3 }
 0x64b   :  { %3805 = vmatprep.subr.bf16.mxu1 %v3941_v62  ;;  %3827 = vmatprep.subr.bf16.mxu0 %v3942_v40 }
 0x64c   :  { %v2802_v20 = vpop.f32.mrb[20].mxu1  ;;  %v2845_v24 = vpop.f32.mrb[16].mxu0 }
 0x64d   :  { %v2858_v13 = vmul.f32 %v2802_v20, %v2466_v4  ;;  %v2860_v32 = vmul.f32 %v2845_v24, %v2509_v59  ;;  %v2804_v23 = vpop.f32.mrb[21].mxu1  ;;  %v2847_v11 = vpop.f32.mrb[17].mxu0 }
 0x64e   :  { %v2859_v19 = vmul.f32 %v2804_v23, %v2468_v52  ;;  %v2861_v61 = vmul.f32 %v2847_v11, %v2511_v6  ;;  %v2806_v60 = vpop.f32.mrb[22].mxu1  ;;  %v2849_v42 = vpop.f32.mrb[18].mxu0  ;;  %3806 = vmatpush3.bf16.msra.mxu1 %v3943_v56  ;;  %3828 = vmatpush3.bf16.msra.mxu0 %v3944_v39  ;;  %v3951_v52 = vld [vmem:[%s5452_s5 + $0x120] sm:$0xff]  }
 0x64f   :  { %v2866_v27 = vmul.f32 %v2806_v60, %v2470_v22  ;;  %v2868_v8 = vmul.f32 %v2849_v42, %v2513_v46  ;;  %v2808_v49 = vpop.f32.mrb[23].mxu1  ;;  %v2851_v30 = vpop.f32.mrb[19].mxu0  ;;  %3807 = vmatprep.subr.bf16.mxu1 %v3945_v41  ;;  %3829 = vmatprep.subr.bf16.mxu0 %v3946_v12  ;;  %v3952_v6 = vld [vmem:[%s5452_s5 + $0x1a0] sm:$0xff]   ;;  %v3953_v22 = vld [vmem:[%s5452_s5 + $0x168] sm:$0xff]  }
 0x650   :  { %v2867_v34 = vmul.f32 %v2808_v49, %v5331_v21  ;;  %v2869_v43 = vmul.f32 %v2851_v30, %v5333_v63  ;;  %v3954_v46 = vld [vmem:[%s5452_s5 + $0x1e8] sm:$0xff]  }
 0x651   :  { %v2874_v10 = vpack.c.bf16 %v2866_v27, %v2858_v13  ;;  %v2876_v0 = vpack.c.bf16 %v2868_v8, %v2860_v32  ;;  %v3955_v21 = vld [vmem:[%s5452_s5 + $0x128] sm:$0xff]  }
 0x652   :  { %v2875_v4 = vpack.c.bf16 %v2867_v34, %v2859_v19  ;;  %v2877_v59 = vpack.c.bf16 %v2869_v43, %v2861_v61  ;;  %3808 = vmatpush3.bf16.msra.mxu1 %v3947_v57  ;;  %3830 = vmatpush3.bf16.msra.mxu0 %v3948_v9  ;;  %v3956_v63 = vld [vmem:[%s5452_s5 + $0x1a8] sm:$0xff]   ;;  %v2100_v19 = vpop.permute.xlu1 %2099  ;;  %v2102_v61 = vpop.permute.xlu0 %2101  ;;  %s4131_s5 = smov [#allocation2]  }
 0x653   :  { %3809 = vmatprep.subr.bf16.mxu1 %v3949_v33  ;;  %3831 = vmatprep.subr.bf16.mxu0 %v3950_v25  ;;  %v2105_v42 = vadd.f32 %v2100_v19, %v5537_v58  ;;  %v2106_v9 = vadd.f32 %v2102_v61, %v5538_v44 }
 0x654   :  { %3504 = vmatprep.mubr.bf16.mxu1 %v2875_v4  ;;  %3545 = vmatprep.mubr.bf16.mxu0 %v2877_v59 }
 0x656   :  { %3810 = vmatpush3.bf16.msra.mxu1 %v3951_v52  ;;  %3832 = vmatpush3.bf16.msra.mxu0 %v3952_v6  ;;  %v2110_v60 = vpop.permute.xlu1 %2109  ;;  %v2112_v57 = vpop.permute.xlu0 %2111 }
 0x657   :  { %3811 = vmatprep.subr.bf16.mxu1 %v3953_v22  ;;  %3833 = vmatprep.subr.bf16.mxu0 %v3954_v46  ;;  %v2115_v27 = vadd.f32 %v2110_v60, %v2105_v42  ;;  %v2116_v49 = vadd.f32 %v2112_v57, %v2106_v9 }
 0x65a   :  { %3812 = vmatpush3.bf16.msra.mxu1 %v3955_v21  ;;  %3834 = vmatpush3.bf16.msra.mxu0 %v3956_v63 }
 0x65b   :  { %3813 = vmatprep.subr.bf16.mxu1 %v3957_v48  ;;  %3835 = vmatprep.subr.bf16.mxu0 %v3958_v14 }
 0x65e   :  { %3814 = vmatpush3.bf16.msra.mxu1 %v3959_v5  ;;  %3836 = vmatpush3.bf16.msra.mxu0 %v3960_v16 }
 0x65f   :  { %3815 = vmatprep.subr.bf16.mxu1 %v3961_v31  ;;  %3837 = vmatprep.subr.bf16.mxu0 %v3962_v54 }
 0x662   :  { %3816 = vmatpush3.bf16.msra.mxu1 %v3963_v26  ;;  %3838 = vmatpush3.bf16.msra.mxu0 %v3964_v47 }
 0x665   :  { %3505 = vmatmul.mubr.bf16.vlgmr.msra.gmra.mrb[28].mxu1 %v2874_v10  ;;  %3546 = vmatmul.mubr.bf16.vlgmr.msra.gmra.mrb[24].mxu0 %v2876_v0 }
 0x718   :  { %v3773_v2 = vpop.f32.mrb[24].mxu1  ;;  %v3795_v18 = vpop.f32.mrb[20].mxu0 }
 0x719   :  { %v3774_v37 = vpop.f32.mrb[25].mxu1  ;;  %v3796_v55 = vpop.f32.mrb[21].mxu0 }
 0x71a   :  { %v3775_v38 = vadd.f32 %v3774_v37, %v3773_v2  ;;  %v3797_v36 = vadd.f32 %v3796_v55, %v3795_v18  ;;  %v3776_v29 = vpop.f32.mrb[26].mxu1  ;;  %v3798_v7 = vpop.f32.mrb[22].mxu0 }
 0x71b   :  { %v3777_v15 = vpop.f32.mrb[27].mxu1  ;;  %v3799_v35 = vpop.f32.mrb[23].mxu0 }
 0x71c   :  { %v3466_v51 = vadd.f32 %v3797_v36, %v3775_v38  ;;  %v3778_v1 = vadd.f32 %v3777_v15, %v3776_v29  ;;  %v3800_v17 = vadd.f32 %v3799_v35, %v3798_v7 }
 0x71e   :  { %v3469_v53 = vadd.f32 %v3800_v17, %v3778_v1 }
 0x738   :  { %v3817_v45 = vpop.f32.mrb[28].mxu1  ;;  %v3839_v28 = vpop.f32.mrb[24].mxu0 }
 0x739   :  { %v3818_v50 = vpop.f32.mrb[29].mxu1  ;;  %v3840_v3 = vpop.f32.mrb[25].mxu0 }
 0x73a   :  { %v3819_v62 = vadd.f32 %v3818_v50, %v3817_v45  ;;  %v3841_v40 = vadd.f32 %v3840_v3, %v3839_v28  ;;  %v3820_v56 = vpop.f32.mrb[30].mxu1  ;;  %v3842_v39 = vpop.f32.mrb[26].mxu0 }
 0x73b   :  { %v3821_v41 = vpop.f32.mrb[31].mxu1  ;;  %v3843_v12 = vpop.f32.mrb[27].mxu0 }
 0x73c   :  { %v3507_v20 = vadd.f32 %v3819_v62, %v3466_v51  ;;  %v3822_v24 = vadd.f32 %v3821_v41, %v3820_v56  ;;  %v3844_v13 = vadd.f32 %v3843_v12, %v3842_v39 }
 0x73e   :  { %v3548_v32 = vadd.f32 %v3841_v40, %v3507_v20  ;;  %v3510_v23 = vadd.f32 %v3822_v24, %v3469_v53 }
 0x740   :  { %v3551_v11 = vadd.f32 %v3844_v13, %v3510_v23  ;;  %3556 = vrot.lane.b32.xlu1 %v3548_v32, %s4128_s13 }
 0x742   :  { %3558 = vrot.lane.b32.xlu0 %v3551_v11, %s4128_s13  ;;  %s3581_s13 = sshll.u32 %s4131_s5, 4  ;;  %s3582_s13 = int_to_ptr.vmem [resolvable:$true] %s3581_s13 }
 0x743   :  { %s4101_s10 = scalar_lea.vmem %s3582_s13, 256  ;;  %p4106_p1 = scmp.lt.s32.totalorder %s3582_s13, %s3582_s13 }
 0x744   :  { %p4102_p0 = scmp.ne.s32.totalorder %s3582_s13, %s4101_s10  ;;  %p4107_p2 = scmp.lt.s32.totalorder %s4101_s10, %s4101_s10 }
 0x746   :  { %p4108_p3 = por %p4107_p2, %p4106_p1 }
 0x748   :  { %p4109_p4 = pnand %p4108_p3, %p4102_p0 }
 0x7b2   :  { %v3557_v8 = vpop.permute.xlu1 %3556 }
 0x7b3   :  { %v3562_v30 = vadd.f32 %v3557_v8, %v2115_v27 }
 0x7b4   :  { %v3559_v33 = vpop.permute.xlu0 %3558 }
 0x7b5   :  { %v3563_v25 = vadd.f32 %v3559_v33, %v2116_v49  ;;  %3566 = vrot.lane.b32.xlu1 %v3562_v30, %s4127_s1 }
 0x7b7   :  { %3568 = vrot.lane.b32.xlu0 %v3563_v25, %s4127_s1 }
 0x827   :  { %v3567_v34 = vpop.permute.xlu1 %3566 }
 0x828   :  { %v3572_v43 = vsel %vm1905_vm12, %v3567_v34, 0.0 }
 0x829   :  { %3574 = vst [vmem:[#allocation2] sm:$0xff] %v3572_v43  ;;  %v3569_v58 = vpop.permute.xlu0 %3568 }
 0x82a   :  { %v3573_v44 = vsel %vm1905_vm12, %v3569_v58, 0.0 }
 0x82b   :  { %3575 = vst [vmem:[#allocation2 + $0x8] sm:$0xff] %v3573_v44 }
 0x82c   :  { %4112 = shalt.err (!%p4109_p4)
}
 0x82d   :  { %s4113_s12 = scalar_lea.hbm %s5453_s6, 256 }
 0x82e   :  { %p4114_p5 = scmp.ne.s32.totalorder %s5453_s6, %s4113_s12  ;;  %p4117_p6 = scmp.lt.u32.totalorder %s4113_s12, %s5453_s6 }
 0x830   :  { %p4119_p7 = pnand %p4117_p6, %p4114_p5 }
 0x832   :  { %4122 = shalt.err (!%p4119_p7)
}
 0x833   :  { %s4132_s4 = smov 128   ;;  %s4133_s18 = smov 8  }
 0x834   :  { %3587 = dma.vmem_to_hbm [thread:$0]  %s3582_s13, 256, %s5453_s6, [#allocation3], %s4132_s4, %s4132_s4, %s4133_s18  }
 0x835   :  { %4123 = dma.done.wait [#allocation3], 256  }
 0x836   :  { %4124 = vsyncadd [#allocation3], 4294967040 }
 0x837   :  { %3591 = vsyncpa [#allocation3], 1 }

</bundles_post_ra>
